<compile_context>
chip_gen: v5e
topology: v5e:2x2
jax: 0.10.0
libtpu: 0.0.40
codegen_flags: <defaults>
</compile_context>

<pallas_src>
import functools

import numpy as np
import jax
import jax.numpy as jnp
from jax.experimental import pallas as pl
from jax.experimental.pallas import tpu as pltpu


# ----------------------------------------------------------------------------
# Host helper: pooling matrix so that  x_flat @ P == avg_pool2d(x, k) flattened
# ----------------------------------------------------------------------------
def _pool_matrix(h, w, k):
    ho, wo = h // k, w // k
    m = np.zeros((h * w, ho * wo), np.float32)
    inv = 1.0 / float(k * k)
    for i in range(h):
        for j in range(w):
            m[i * w + j, (i // k) * wo + (j // k)] = inv
    return jnp.asarray(m)


# ----------------------------------------------------------------------------
# Fused KD loss kernel
#   target_ref                : (N,) int32 in SMEM (scalar prefetch)
#   per pair p                : s_feat (Bt, Cs, HWs), t_feat (Bt, Ct, HWt),
#                               optional pooling matrices (HW_big, HW_small)
#   logits                    : s_logits (Bt, 1, K), t_logits (Bt, 1, K)
#   outputs (one row / block) : fm partial sum per pair, KD partial sum, CE partial sum
# ----------------------------------------------------------------------------
def _fused_kd_loss_kernel(target_ref, *refs, num_pairs, pair_pool, b_tile,
                          num_classes, temperature):
    n_in = 2 * num_pairs + sum(int(sp) + int(tp) for sp, tp in pair_pool) + 2
    in_refs = refs[:n_in]
    out_refs = refs[n_in:]

    eps = jnp.float32(1e-12)

    # ---- attention-transfer feature-map losses (pooling fused via MXU matmul) ----
    idx = 0
    fm_sums = []
    for p in range(num_pairs):
        s_pool, t_pool = pair_pool[p]
        s_ref = in_refs[idx]; idx += 1
        t_ref = in_refs[idx]; idx += 1
        ps_ref = pt_ref = None
        if s_pool:
            ps_ref = in_refs[idx]; idx += 1
        if t_pool:
            pt_ref = in_refs[idx]; idx += 1

        acc = jnp.float32(0.0)
        for b in range(b_tile):                      # static unroll over batch tile
            sb = s_ref[b].astype(jnp.float32)        # (Cs, HWs)  (cast in-kernel)
            if s_pool:                               # avg_pool2d as matmul
                sb = jnp.dot(sb, ps_ref[...], preferred_element_type=jnp.float32)
            tb = t_ref[b].astype(jnp.float32)        # (Ct, HWt)
            if t_pool:
                tb = jnp.dot(tb, pt_ref[...], preferred_element_type=jnp.float32)

            # at(x) = F.normalize(x.pow(2).mean(1).view(N,-1))   (L2, eps=1e-12)
            a_s = jnp.mean(sb * sb, axis=0, keepdims=True)   # (1, HW_target)
            a_t = jnp.mean(tb * tb, axis=0, keepdims=True)
            a_s = a_s / jnp.maximum(jnp.sqrt(jnp.sum(a_s * a_s)), eps)
            a_t = a_t / jnp.maximum(jnp.sqrt(jnp.sum(a_t * a_t)), eps)
            d = a_s - a_t
            acc = acc + jnp.sum(d * d)
        fm_sums.append(acc)

    # ---- KD logits loss + cross entropy (shared row-max, T==1 specialization) ----
    s_log_ref = in_refs[idx]; idx += 1
    t_log_ref = in_refs[idx]; idx += 1

    s = s_log_ref[...].astype(jnp.float32)           # (Bt, 1, K)
    t = t_log_ref[...].astype(jnp.float32)

    z_s = s - jnp.max(s, axis=-1, keepdims=True)     # max(s/T) == max(s)/T (T > 0)
    lsm_s = z_s - jnp.log(jnp.sum(jnp.exp(z_s), axis=-1, keepdims=True))
    if temperature == 1.0:
        lsm_s_T = lsm_s
    else:
        z_s_T = z_s / jnp.float32(temperature)
        lsm_s_T = z_s_T - jnp.log(jnp.sum(jnp.exp(z_s_T), axis=-1, keepdims=True))

    z_t = t - jnp.max(t, axis=-1, keepdims=True)
    if temperature != 1.0:
        z_t = z_t / jnp.float32(temperature)
    lsm_t_T = z_t - jnp.log(jnp.sum(jnp.exp(z_t), axis=-1, keepdims=True))
    t_p = jnp.exp(lsm_t_T)
    kd_sum = jnp.sum(t_p * (lsm_t_T - lsm_s_T))      # sum of y*(log y - x)

    row_base = pl.program_id(0) * b_tile
    kiota = jax.lax.broadcasted_iota(jnp.int32, (1, num_classes), 1)
    ce_sum = jnp.float32(0.0)
    for r in range(b_tile):
        tgt = target_ref[row_base + r]               # scalar read from SMEM
        onehot = (kiota == tgt).astype(jnp.float32)  # (1, K)
        ce_sum = ce_sum - jnp.sum(lsm_s[r] * onehot)

    # ---- per-block partial outputs (batch grid axis is "parallel": no races) ----
    for p in range(num_pairs):
        out_refs[p][...] = fm_sums[p].reshape(1, 1, 1)
    out_refs[num_pairs][...] = kd_sum.reshape(1, 1, 1)
    out_refs[num_pairs + 1][...] = ce_sum.reshape(1, 1, 1)


# ----------------------------------------------------------------------------
# Wrapper: mirrors Network_KD.compute_loss (use_kd=True, fm_method='attn')
# ----------------------------------------------------------------------------
def network_kd_compute_loss(student_outputs, teacher_outputs, target,
                            kd_alpha=0.5, kd_beta=1.0, temperature=1.0,
                            b_tile=None):
    s_feats, s_logits = list(student_outputs[:-1]), student_outputs[-1]
    t_feats, t_logits = list(teacher_outputs[:-1]), teacher_outputs[-1]
    assert len(s_feats) == len(t_feats)
    num_pairs = len(s_feats)
    n, k = s_logits.shape

    if b_tile is None:
        b_tile = n if n <= 16 else next(c for c in (16, 8, 4, 2, 1) if n % c == 0)
    assert n % b_tile == 0
    num_blocks = n // b_tile

    inputs, in_specs, pair_pool, hw_targets = [], [], [], []
    for s_f, t_f in zip(s_feats, t_feats):
        ns, cs, hs, ws = s_f.shape
        nt, ct, ht, wt = t_f.shape
        assert ns == n and nt == n
        # Native dtype, flattened spatial (free host reshape); cast happens in-kernel.
        inputs.append(s_f.reshape(ns, cs, hs * ws))
        in_specs.append(pl.BlockSpec((b_tile, cs, hs * ws), lambda b, tgt: (b, 0, 0)))
        inputs.append(t_f.reshape(nt, ct, ht * wt))
        in_specs.append(pl.BlockSpec((b_tile, ct, ht * wt), lambda b, tgt: (b, 0, 0)))

        s_pool, t_pool = ht < hs, ht > hs
        if s_pool:
            pm = _pool_matrix(hs, ws, hs // ht)
            inputs.append(pm)
            in_specs.append(pl.BlockSpec(pm.shape, lambda b, tgt: (0, 0)))
            hw_targets.append(ht * wt)
        elif t_pool:
            pm = _pool_matrix(ht, wt, ht // hs)
            inputs.append(pm)
            in_specs.append(pl.BlockSpec(pm.shape, lambda b, tgt: (0, 0)))
            hw_targets.append(hs * ws)
        else:
            hw_targets.append(hs * ws)
        pair_pool.append((s_pool, t_pool))

    inputs.append(s_logits.reshape(n, 1, k))
    in_specs.append(pl.BlockSpec((b_tile, 1, k), lambda b, tgt: (b, 0, 0)))
    inputs.append(t_logits.reshape(n, 1, k))
    in_specs.append(pl.BlockSpec((b_tile, 1, k), lambda b, tgt: (b, 0, 0)))

    n_out = num_pairs + 2
    out_shape = tuple(jax.ShapeDtypeStruct((num_blocks, 1, 1), jnp.float32)
                      for _ in range(n_out))
    out_specs = tuple(pl.BlockSpec((1, 1, 1), lambda b, tgt: (b, 0, 0))
                      for _ in range(n_out))

    kernel = functools.partial(
        _fused_kd_loss_kernel,
        num_pairs=num_pairs, pair_pool=tuple(pair_pool), b_tile=b_tile,
        num_classes=k, temperature=float(temperature))

    results = pl.pallas_call(
        kernel,
        out_shape=out_shape,
        grid_spec=pltpu.PrefetchScalarGridSpec(
            num_scalar_prefetch=1,            # target lives in SMEM
            grid=(num_blocks,),
            in_specs=in_specs,
            out_specs=out_specs,
        ),
        compiler_params=pltpu.CompilerParams(
            dimension_semantics=("parallel",),          # batch blocks are independent
            vmem_limit_bytes=32 * 1024 * 1024,          # explicit, fits v5e/v6e/v7x
        ),
    )(target.astype(jnp.int32), *inputs)

    # ---- combine partials (matches PyTorch reductions exactly) ----
    fm_loss = jnp.float32(0.0)
    for p in range(num_pairs):
        fm_loss = fm_loss + jnp.sum(results[p]) / jnp.float32(n * hw_targets[p])
    if num_pairs > 0:
        fm_loss = fm_loss / jnp.float32(num_pairs)
    # nn.KLDivLoss() default reduction='mean' => divide by N*K, then * T^2
    kd_loss = (jnp.sum(results[num_pairs]) / jnp.float32(n * k)
               * jnp.float32(temperature) * jnp.float32(temperature))
    ce_loss = jnp.sum(results[num_pairs + 1]) / jnp.float32(n)

    return (jnp.float32(kd_alpha) * kd_loss
            + jnp.float32(1.0 - kd_alpha) * ce_loss
            + jnp.float32(kd_beta) * fm_loss)


# ----------------------------------------------------------------------------
# Pure-JAX reference (sanity check only)
# ----------------------------------------------------------------------------
def _avg_pool2d(x, k):
    n, c, h, w = x.shape
    return x.reshape(n, c, h // k, k, w // k, k).mean(axis=(3, 5))


def _ref_loss(student_outputs, teacher_outputs, target, kd_alpha, kd_beta, T):
    def at(x):
        n = x.shape[0]
        a = jnp.mean(x * x, axis=1).reshape(n, -1)
        return a / jnp.maximum(jnp.linalg.norm(a, axis=1, keepdims=True), 1e-12)

    s_feats, t_feats = student_outputs[:-1], teacher_outputs[:-1]
    fm = 0.0
    for s_f, t_f in zip(s_feats, t_feats):
        if t_f.shape[2] < s_f.shape[2]:
            s_f = _avg_pool2d(s_f, s_f.shape[2] // t_f.shape[2])
        elif t_f.shape[2] > s_f.shape[2]:
            t_f = _avg_pool2d(t_f, t_f.shape[2] // s_f.shape[2])
        fm = fm + jnp.mean((at(s_f) - at(t_f)) ** 2)
    fm = fm / max(len(t_feats), 1)

    s, t = student_outputs[-1], teacher_outputs[-1]
    s_lsm = jax.nn.log_softmax(s / T, axis=1)
    t_lsm = jax.nn.log_softmax(t / T, axis=1)
    t_p = jnp.exp(t_lsm)
    kd = jnp.mean(t_p * (t_lsm - s_lsm)) * T * T
    lsm = jax.nn.log_softmax(s, axis=1)
    ce = -jnp.mean(lsm[jnp.arange(s.shape[0]), target])
    return kd_alpha * kd + (1 - kd_alpha) * ce + kd_beta * fm


# ----------------------------------------------------------------------------
# Main
# ----------------------------------------------------------------------------
if __name__ == "__main__":
    key = jax.random.PRNGKey(0)
    ks = jax.random.split(key, 8)

    batch = 2
    num_classes = 10

    # Synthetic stand-ins for the (undefined) backbone outputs:
    # two intermediate feature-map pairs + final logits.
    student_feats = [
        jax.random.normal(ks[0], (batch, 8, 16, 16), jnp.float32),   # student stage 0
        jax.random.normal(ks[1], (batch, 16, 8, 8), jnp.float32),    # student stage 1
    ]
    teacher_feats = [
        jax.random.normal(ks[2], (batch, 16, 8, 8), jnp.float32),    # teacher smaller -> student pooled
        jax.random.normal(ks[3], (batch, 32, 16, 16), jnp.float32),  # teacher larger  -> teacher pooled
    ]
    student_logits = jax.random.normal(ks[4], (batch, num_classes), jnp.float32)
    teacher_logits = jax.random.normal(ks[5], (batch, num_classes), jnp.float32)
    target = jax.random.randint(ks[6], (batch,), 0, num_classes, jnp.int32)

    student_outputs = student_feats + [student_logits]
    teacher_outputs = teacher_feats + [teacher_logits]

    kd_alpha, kd_beta = 0.5, 1.0

    for T in (1.0, 4.0):   # exercises both the T==1 fast path and the general path
        loss = network_kd_compute_loss(student_outputs, teacher_outputs, target,
                                       kd_alpha=kd_alpha, kd_beta=kd_beta,
                                       temperature=T)
        loss = jax.block_until_ready(loss)
        ref = jax.block_until_ready(
            _ref_loss(student_outputs, teacher_outputs, target, kd_alpha, kd_beta, T))
        assert jnp.isfinite(loss), "non-finite loss"
        assert jnp.allclose(loss, ref, rtol=5e-4, atol=1e-5), (T, loss, ref)

    print("KERNEL_OK")
</pallas_src>

<mosaic_0001>
module attributes {stable_mosaic.version = 11 : i64} {
  func.func @_fused_kd_loss_kernel(%arg0: i32, %arg1: memref<2xi32, #tpu.memory_space<smem>>, %arg2: memref<2x8x256xf32, #tpu.memory_space<vmem>>, %arg3: memref<2x16x64xf32, #tpu.memory_space<vmem>>, %arg4: memref<256x64xf32, #tpu.memory_space<vmem>>, %arg5: memref<2x16x64xf32, #tpu.memory_space<vmem>>, %arg6: memref<2x32x256xf32, #tpu.memory_space<vmem>>, %arg7: memref<256x64xf32, #tpu.memory_space<vmem>>, %arg8: memref<2x1x10xf32, #tpu.memory_space<vmem>>, %arg9: memref<2x1x10xf32, #tpu.memory_space<vmem>>, %arg10: memref<1x1x1xf32, #tpu.memory_space<vmem>>, %arg11: memref<1x1x1xf32, #tpu.memory_space<vmem>>, %arg12: memref<1x1x1xf32, #tpu.memory_space<vmem>>, %arg13: memref<1x1x1xf32, #tpu.memory_space<vmem>>) attributes {dimension_semantics = [#tpu.dimension_semantics<parallel>], iteration_bounds = array<i64: 1>, scalar_prefetch = 1 : i64, scratch_operands = 0 : i64, tpu.core_type = #tpu.core_type<tc>, window_params = [{transform_indices = @transform_0, window_bounds = array<i64: 2, 8, 256>}, {transform_indices = @transform_1, window_bounds = array<i64: 2, 16, 64>}, {pipeline_mode = #tpu.pipeline_mode<synchronous>, transform_indices = @transform_2, window_bounds = array<i64: 256, 64>}, {transform_indices = @transform_3, window_bounds = array<i64: 2, 16, 64>}, {transform_indices = @transform_4, window_bounds = array<i64: 2, 32, 256>}, {pipeline_mode = #tpu.pipeline_mode<synchronous>, transform_indices = @transform_5, window_bounds = array<i64: 256, 64>}, {transform_indices = @transform_6, window_bounds = array<i64: 2, 1, 10>}, {transform_indices = @transform_7, window_bounds = array<i64: 2, 1, 10>}, {transform_indices = @transform_8, window_bounds = array<i64: 1, 1, 1>}, {transform_indices = @transform_9, window_bounds = array<i64: 1, 1, 1>}, {transform_indices = @transform_10, window_bounds = array<i64: 1, 1, 1>}, {transform_indices = @transform_11, window_bounds = array<i64: 1, 1, 1>}]} {
    %c0 = arith.constant 0 : index
    %c0_0 = arith.constant 0 : index
    %c0_1 = arith.constant 0 : index
    %0 = vector.load %arg2[%c0, %c0_0, %c0_1] : memref<2x8x256xf32, #tpu.memory_space<vmem>>, vector<1x8x256xf32>
    %1 = vector.shape_cast %0 : vector<1x8x256xf32> to vector<8x256xf32>
    %c0_2 = arith.constant 0 : index
    %c0_3 = arith.constant 0 : index
    %2 = vector.load %arg4[%c0_2, %c0_3] : memref<256x64xf32, #tpu.memory_space<vmem>>, vector<256x64xf32>
    %cst = arith.constant dense<0.000000e+00> : vector<8x64xf32>
    %3 = tpu.matmul %1, %2, %cst {dimension_numbers = #tpu.dot_dimension_numbers<[1], [0], [0], [1], [0, 0, 1, 1], [], []>} : vector<8x256xf32>, vector<256x64xf32>, vector<8x64xf32> -> vector<8x64xf32>
    %c0_4 = arith.constant 0 : index
    %c0_5 = arith.constant 0 : index
    %c0_6 = arith.constant 0 : index
    %4 = vector.load %arg3[%c0_4, %c0_5, %c0_6] : memref<2x16x64xf32, #tpu.memory_space<vmem>>, vector<1x16x64xf32>
    %5 = vector.shape_cast %4 : vector<1x16x64xf32> to vector<16x64xf32>
    %6 = arith.mulf %3, %3 : vector<8x64xf32>
    %cst_7 = arith.constant dense<0.000000e+00> : vector<64xf32>
    %7 = vector.multi_reduction <add>, %6, %cst_7 [0] : vector<8x64xf32> to vector<64xf32>
    %8 = vector.shape_cast %7 : vector<64xf32> to vector<1x64xf32>
    %cst_8 = arith.constant 8.000000e+00 : f32
    %9 = vector.broadcast %cst_8 : f32 to vector<1x64xf32>
    %10 = arith.divf %8, %9 : vector<1x64xf32>
    %11 = arith.mulf %5, %5 : vector<16x64xf32>
    %cst_9 = arith.constant dense<0.000000e+00> : vector<64xf32>
    %12 = vector.multi_reduction <add>, %11, %cst_9 [0] : vector<16x64xf32> to vector<64xf32>
    %13 = vector.shape_cast %12 : vector<64xf32> to vector<1x64xf32>
    %cst_10 = arith.constant 1.600000e+01 : f32
    %14 = vector.broadcast %cst_10 : f32 to vector<1x64xf32>
    %15 = arith.divf %13, %14 : vector<1x64xf32>
    %16 = arith.mulf %10, %10 : vector<1x64xf32>
    %17 = vector.shape_cast %16 : vector<1x64xf32> to vector<1x1x64xf32>
    %cst_11 = arith.constant dense<0.000000e+00> : vector<1xf32>
    %18 = vector.multi_reduction <add>, %17, %cst_11 [1, 2] : vector<1x1x64xf32> to vector<1xf32>
    %19 = vector.shape_cast %18 : vector<1xf32> to vector<1x1x1xf32>
    %20 = vector.extract %19[0, 0, 0] : f32 from vector<1x1x1xf32>
    %21 = math.sqrt %20 : f32
    %cst_12 = arith.constant 9.99999996E-13 : f32
    %22 = arith.maximumf %21, %cst_12 : f32
    %23 = vector.broadcast %22 : f32 to vector<1x64xf32>
    %24 = arith.divf %10, %23 : vector<1x64xf32>
    %25 = arith.mulf %15, %15 : vector<1x64xf32>
    %26 = vector.shape_cast %25 : vector<1x64xf32> to vector<1x1x64xf32>
    %cst_13 = arith.constant dense<0.000000e+00> : vector<1xf32>
    %27 = vector.multi_reduction <add>, %26, %cst_13 [1, 2] : vector<1x1x64xf32> to vector<1xf32>
    %28 = vector.shape_cast %27 : vector<1xf32> to vector<1x1x1xf32>
    %29 = vector.extract %28[0, 0, 0] : f32 from vector<1x1x1xf32>
    %30 = math.sqrt %29 : f32
    %cst_14 = arith.constant 9.99999996E-13 : f32
    %31 = arith.maximumf %30, %cst_14 : f32
    %32 = vector.broadcast %31 : f32 to vector<1x64xf32>
    %33 = arith.divf %15, %32 : vector<1x64xf32>
    %34 = arith.subf %24, %33 : vector<1x64xf32>
    %35 = arith.mulf %34, %34 : vector<1x64xf32>
    %36 = vector.shape_cast %35 : vector<1x64xf32> to vector<1x1x64xf32>
    %cst_15 = arith.constant dense<0.000000e+00> : vector<1xf32>
    %37 = vector.multi_reduction <add>, %36, %cst_15 [1, 2] : vector<1x1x64xf32> to vector<1xf32>
    %38 = vector.shape_cast %37 : vector<1xf32> to vector<1x1x1xf32>
    %39 = vector.extract %38[0, 0, 0] : f32 from vector<1x1x1xf32>
    %cst_16 = arith.constant 0.000000e+00 : f32
    %40 = arith.addf %cst_16, %39 : f32
    %c1 = arith.constant 1 : index
    %c0_17 = arith.constant 0 : index
    %c0_18 = arith.constant 0 : index
    %41 = vector.load %arg2[%c1, %c0_17, %c0_18] : memref<2x8x256xf32, #tpu.memory_space<vmem>>, vector<1x8x256xf32>
    %42 = vector.shape_cast %41 : vector<1x8x256xf32> to vector<8x256xf32>
    %c0_19 = arith.constant 0 : index
    %c0_20 = arith.constant 0 : index
    %43 = vector.load %arg4[%c0_19, %c0_20] : memref<256x64xf32, #tpu.memory_space<vmem>>, vector<256x64xf32>
    %cst_21 = arith.constant dense<0.000000e+00> : vector<8x64xf32>
    %44 = tpu.matmul %42, %43, %cst_21 {dimension_numbers = #tpu.dot_dimension_numbers<[1], [0], [0], [1], [0, 0, 1, 1], [], []>} : vector<8x256xf32>, vector<256x64xf32>, vector<8x64xf32> -> vector<8x64xf32>
    %c1_22 = arith.constant 1 : index
    %c0_23 = arith.constant 0 : index
    %c0_24 = arith.constant 0 : index
    %45 = vector.load %arg3[%c1_22, %c0_23, %c0_24] : memref<2x16x64xf32, #tpu.memory_space<vmem>>, vector<1x16x64xf32>
    %46 = vector.shape_cast %45 : vector<1x16x64xf32> to vector<16x64xf32>
    %47 = arith.mulf %44, %44 : vector<8x64xf32>
    %cst_25 = arith.constant dense<0.000000e+00> : vector<64xf32>
    %48 = vector.multi_reduction <add>, %47, %cst_25 [0] : vector<8x64xf32> to vector<64xf32>
    %49 = vector.shape_cast %48 : vector<64xf32> to vector<1x64xf32>
    %cst_26 = arith.constant 8.000000e+00 : f32
    %50 = vector.broadcast %cst_26 : f32 to vector<1x64xf32>
    %51 = arith.divf %49, %50 : vector<1x64xf32>
    %52 = arith.mulf %46, %46 : vector<16x64xf32>
    %cst_27 = arith.constant dense<0.000000e+00> : vector<64xf32>
    %53 = vector.multi_reduction <add>, %52, %cst_27 [0] : vector<16x64xf32> to vector<64xf32>
    %54 = vector.shape_cast %53 : vector<64xf32> to vector<1x64xf32>
    %cst_28 = arith.constant 1.600000e+01 : f32
    %55 = vector.broadcast %cst_28 : f32 to vector<1x64xf32>
    %56 = arith.divf %54, %55 : vector<1x64xf32>
    %57 = arith.mulf %51, %51 : vector<1x64xf32>
    %58 = vector.shape_cast %57 : vector<1x64xf32> to vector<1x1x64xf32>
    %cst_29 = arith.constant dense<0.000000e+00> : vector<1xf32>
    %59 = vector.multi_reduction <add>, %58, %cst_29 [1, 2] : vector<1x1x64xf32> to vector<1xf32>
    %60 = vector.shape_cast %59 : vector<1xf32> to vector<1x1x1xf32>
    %61 = vector.extract %60[0, 0, 0] : f32 from vector<1x1x1xf32>
    %62 = math.sqrt %61 : f32
    %cst_30 = arith.constant 9.99999996E-13 : f32
    %63 = arith.maximumf %62, %cst_30 : f32
    %64 = vector.broadcast %63 : f32 to vector<1x64xf32>
    %65 = arith.divf %51, %64 : vector<1x64xf32>
    %66 = arith.mulf %56, %56 : vector<1x64xf32>
    %67 = vector.shape_cast %66 : vector<1x64xf32> to vector<1x1x64xf32>
    %cst_31 = arith.constant dense<0.000000e+00> : vector<1xf32>
    %68 = vector.multi_reduction <add>, %67, %cst_31 [1, 2] : vector<1x1x64xf32> to vector<1xf32>
    %69 = vector.shape_cast %68 : vector<1xf32> to vector<1x1x1xf32>
    %70 = vector.extract %69[0, 0, 0] : f32 from vector<1x1x1xf32>
    %71 = math.sqrt %70 : f32
    %cst_32 = arith.constant 9.99999996E-13 : f32
    %72 = arith.maximumf %71, %cst_32 : f32
    %73 = vector.broadcast %72 : f32 to vector<1x64xf32>
    %74 = arith.divf %56, %73 : vector<1x64xf32>
    %75 = arith.subf %65, %74 : vector<1x64xf32>
    %76 = arith.mulf %75, %75 : vector<1x64xf32>
    %77 = vector.shape_cast %76 : vector<1x64xf32> to vector<1x1x64xf32>
    %cst_33 = arith.constant dense<0.000000e+00> : vector<1xf32>
    %78 = vector.multi_reduction <add>, %77, %cst_33 [1, 2] : vector<1x1x64xf32> to vector<1xf32>
    %79 = vector.shape_cast %78 : vector<1xf32> to vector<1x1x1xf32>
    %80 = vector.extract %79[0, 0, 0] : f32 from vector<1x1x1xf32>
    %81 = arith.addf %40, %80 : f32
    %c0_34 = arith.constant 0 : index
    %c0_35 = arith.constant 0 : index
    %c0_36 = arith.constant 0 : index
    %82 = vector.load %arg5[%c0_34, %c0_35, %c0_36] : memref<2x16x64xf32, #tpu.memory_space<vmem>>, vector<1x16x64xf32>
    %83 = vector.shape_cast %82 : vector<1x16x64xf32> to vector<16x64xf32>
    %c0_37 = arith.constant 0 : index
    %c0_38 = arith.constant 0 : index
    %c0_39 = arith.constant 0 : index
    %84 = vector.load %arg6[%c0_37, %c0_38, %c0_39] : memref<2x32x256xf32, #tpu.memory_space<vmem>>, vector<1x32x256xf32>
    %85 = vector.shape_cast %84 : vector<1x32x256xf32> to vector<32x256xf32>
    %c0_40 = arith.constant 0 : index
    %c0_41 = arith.constant 0 : index
    %86 = vector.load %arg7[%c0_40, %c0_41] : memref<256x64xf32, #tpu.memory_space<vmem>>, vector<256x64xf32>
    %cst_42 = arith.constant dense<0.000000e+00> : vector<32x64xf32>
    %87 = tpu.matmul %85, %86, %cst_42 {dimension_numbers = #tpu.dot_dimension_numbers<[1], [0], [0], [1], [0, 0, 1, 1], [], []>} : vector<32x256xf32>, vector<256x64xf32>, vector<32x64xf32> -> vector<32x64xf32>
    %88 = arith.mulf %83, %83 : vector<16x64xf32>
    %cst_43 = arith.constant dense<0.000000e+00> : vector<64xf32>
    %89 = vector.multi_reduction <add>, %88, %cst_43 [0] : vector<16x64xf32> to vector<64xf32>
    %90 = vector.shape_cast %89 : vector<64xf32> to vector<1x64xf32>
    %cst_44 = arith.constant 1.600000e+01 : f32
    %91 = vector.broadcast %cst_44 : f32 to vector<1x64xf32>
    %92 = arith.divf %90, %91 : vector<1x64xf32>
    %93 = arith.mulf %87, %87 : vector<32x64xf32>
    %cst_45 = arith.constant dense<0.000000e+00> : vector<64xf32>
    %94 = vector.multi_reduction <add>, %93, %cst_45 [0] : vector<32x64xf32> to vector<64xf32>
    %95 = vector.shape_cast %94 : vector<64xf32> to vector<1x64xf32>
    %cst_46 = arith.constant 3.200000e+01 : f32
    %96 = vector.broadcast %cst_46 : f32 to vector<1x64xf32>
    %97 = arith.divf %95, %96 : vector<1x64xf32>
    %98 = arith.mulf %92, %92 : vector<1x64xf32>
    %99 = vector.shape_cast %98 : vector<1x64xf32> to vector<1x1x64xf32>
    %cst_47 = arith.constant dense<0.000000e+00> : vector<1xf32>
    %100 = vector.multi_reduction <add>, %99, %cst_47 [1, 2] : vector<1x1x64xf32> to vector<1xf32>
    %101 = vector.shape_cast %100 : vector<1xf32> to vector<1x1x1xf32>
    %102 = vector.extract %101[0, 0, 0] : f32 from vector<1x1x1xf32>
    %103 = math.sqrt %102 : f32
    %cst_48 = arith.constant 9.99999996E-13 : f32
    %104 = arith.maximumf %103, %cst_48 : f32
    %105 = vector.broadcast %104 : f32 to vector<1x64xf32>
    %106 = arith.divf %92, %105 : vector<1x64xf32>
    %107 = arith.mulf %97, %97 : vector<1x64xf32>
    %108 = vector.shape_cast %107 : vector<1x64xf32> to vector<1x1x64xf32>
    %cst_49 = arith.constant dense<0.000000e+00> : vector<1xf32>
    %109 = vector.multi_reduction <add>, %108, %cst_49 [1, 2] : vector<1x1x64xf32> to vector<1xf32>
    %110 = vector.shape_cast %109 : vector<1xf32> to vector<1x1x1xf32>
    %111 = vector.extract %110[0, 0, 0] : f32 from vector<1x1x1xf32>
    %112 = math.sqrt %111 : f32
    %cst_50 = arith.constant 9.99999996E-13 : f32
    %113 = arith.maximumf %112, %cst_50 : f32
    %114 = vector.broadcast %113 : f32 to vector<1x64xf32>
    %115 = arith.divf %97, %114 : vector<1x64xf32>
    %116 = arith.subf %106, %115 : vector<1x64xf32>
    %117 = arith.mulf %116, %116 : vector<1x64xf32>
    %118 = vector.shape_cast %117 : vector<1x64xf32> to vector<1x1x64xf32>
    %cst_51 = arith.constant dense<0.000000e+00> : vector<1xf32>
    %119 = vector.multi_reduction <add>, %118, %cst_51 [1, 2] : vector<1x1x64xf32> to vector<1xf32>
    %120 = vector.shape_cast %119 : vector<1xf32> to vector<1x1x1xf32>
    %121 = vector.extract %120[0, 0, 0] : f32 from vector<1x1x1xf32>
    %cst_52 = arith.constant 0.000000e+00 : f32
    %122 = arith.addf %cst_52, %121 : f32
    %c1_53 = arith.constant 1 : index
    %c0_54 = arith.constant 0 : index
    %c0_55 = arith.constant 0 : index
    %123 = vector.load %arg5[%c1_53, %c0_54, %c0_55] : memref<2x16x64xf32, #tpu.memory_space<vmem>>, vector<1x16x64xf32>
    %124 = vector.shape_cast %123 : vector<1x16x64xf32> to vector<16x64xf32>
    %c1_56 = arith.constant 1 : index
    %c0_57 = arith.constant 0 : index
    %c0_58 = arith.constant 0 : index
    %125 = vector.load %arg6[%c1_56, %c0_57, %c0_58] : memref<2x32x256xf32, #tpu.memory_space<vmem>>, vector<1x32x256xf32>
    %126 = vector.shape_cast %125 : vector<1x32x256xf32> to vector<32x256xf32>
    %c0_59 = arith.constant 0 : index
    %c0_60 = arith.constant 0 : index
    %127 = vector.load %arg7[%c0_59, %c0_60] : memref<256x64xf32, #tpu.memory_space<vmem>>, vector<256x64xf32>
    %cst_61 = arith.constant dense<0.000000e+00> : vector<32x64xf32>
    %128 = tpu.matmul %126, %127, %cst_61 {dimension_numbers = #tpu.dot_dimension_numbers<[1], [0], [0], [1], [0, 0, 1, 1], [], []>} : vector<32x256xf32>, vector<256x64xf32>, vector<32x64xf32> -> vector<32x64xf32>
    %129 = arith.mulf %124, %124 : vector<16x64xf32>
    %cst_62 = arith.constant dense<0.000000e+00> : vector<64xf32>
    %130 = vector.multi_reduction <add>, %129, %cst_62 [0] : vector<16x64xf32> to vector<64xf32>
    %131 = vector.shape_cast %130 : vector<64xf32> to vector<1x64xf32>
    %cst_63 = arith.constant 1.600000e+01 : f32
    %132 = vector.broadcast %cst_63 : f32 to vector<1x64xf32>
    %133 = arith.divf %131, %132 : vector<1x64xf32>
    %134 = arith.mulf %128, %128 : vector<32x64xf32>
    %cst_64 = arith.constant dense<0.000000e+00> : vector<64xf32>
    %135 = vector.multi_reduction <add>, %134, %cst_64 [0] : vector<32x64xf32> to vector<64xf32>
    %136 = vector.shape_cast %135 : vector<64xf32> to vector<1x64xf32>
    %cst_65 = arith.constant 3.200000e+01 : f32
    %137 = vector.broadcast %cst_65 : f32 to vector<1x64xf32>
    %138 = arith.divf %136, %137 : vector<1x64xf32>
    %139 = arith.mulf %133, %133 : vector<1x64xf32>
    %140 = vector.shape_cast %139 : vector<1x64xf32> to vector<1x1x64xf32>
    %cst_66 = arith.constant dense<0.000000e+00> : vector<1xf32>
    %141 = vector.multi_reduction <add>, %140, %cst_66 [1, 2] : vector<1x1x64xf32> to vector<1xf32>
    %142 = vector.shape_cast %141 : vector<1xf32> to vector<1x1x1xf32>
    %143 = vector.extract %142[0, 0, 0] : f32 from vector<1x1x1xf32>
    %144 = math.sqrt %143 : f32
    %cst_67 = arith.constant 9.99999996E-13 : f32
    %145 = arith.maximumf %144, %cst_67 : f32
    %146 = vector.broadcast %145 : f32 to vector<1x64xf32>
    %147 = arith.divf %133, %146 : vector<1x64xf32>
    %148 = arith.mulf %138, %138 : vector<1x64xf32>
    %149 = vector.shape_cast %148 : vector<1x64xf32> to vector<1x1x64xf32>
    %cst_68 = arith.constant dense<0.000000e+00> : vector<1xf32>
    %150 = vector.multi_reduction <add>, %149, %cst_68 [1, 2] : vector<1x1x64xf32> to vector<1xf32>
    %151 = vector.shape_cast %150 : vector<1xf32> to vector<1x1x1xf32>
    %152 = vector.extract %151[0, 0, 0] : f32 from vector<1x1x1xf32>
    %153 = math.sqrt %152 : f32
    %cst_69 = arith.constant 9.99999996E-13 : f32
    %154 = arith.maximumf %153, %cst_69 : f32
    %155 = vector.broadcast %154 : f32 to vector<1x64xf32>
    %156 = arith.divf %138, %155 : vector<1x64xf32>
    %157 = arith.subf %147, %156 : vector<1x64xf32>
    %158 = arith.mulf %157, %157 : vector<1x64xf32>
    %159 = vector.shape_cast %158 : vector<1x64xf32> to vector<1x1x64xf32>
    %cst_70 = arith.constant dense<0.000000e+00> : vector<1xf32>
    %160 = vector.multi_reduction <add>, %159, %cst_70 [1, 2] : vector<1x1x64xf32> to vector<1xf32>
    %161 = vector.shape_cast %160 : vector<1xf32> to vector<1x1x1xf32>
    %162 = vector.extract %161[0, 0, 0] : f32 from vector<1x1x1xf32>
    %163 = arith.addf %122, %162 : f32
    %c0_71 = arith.constant 0 : index
    %c0_72 = arith.constant 0 : index
    %c0_73 = arith.constant 0 : index
    %164 = vector.load %arg8[%c0_71, %c0_72, %c0_73] : memref<2x1x10xf32, #tpu.memory_space<vmem>>, vector<2x1x10xf32>
    %c0_74 = arith.constant 0 : index
    %c0_75 = arith.constant 0 : index
    %c0_76 = arith.constant 0 : index
    %165 = vector.load %arg9[%c0_74, %c0_75, %c0_76] : memref<2x1x10xf32, #tpu.memory_space<vmem>>, vector<2x1x10xf32>
    %cst_77 = arith.constant dense<0xFF800000> : vector<2x1xf32>
    %166 = vector.multi_reduction <maximumf>, %164, %cst_77 [2] : vector<2x1x10xf32> to vector<2x1xf32>
    %167 = vector.shape_cast %166 : vector<2x1xf32> to vector<2x1x1xf32>
    %168 = vector.broadcast %167 : vector<2x1x1xf32> to vector<2x1x10xf32>
    %169 = arith.subf %164, %168 : vector<2x1x10xf32>
    %170 = math.exp %169 : vector<2x1x10xf32>
    %cst_78 = arith.constant dense<0.000000e+00> : vector<2x1xf32>
    %171 = vector.multi_reduction <add>, %170, %cst_78 [2] : vector<2x1x10xf32> to vector<2x1xf32>
    %172 = vector.shape_cast %171 : vector<2x1xf32> to vector<2x1x1xf32>
    %173 = math.log %172 : vector<2x1x1xf32>
    %174 = vector.broadcast %173 : vector<2x1x1xf32> to vector<2x1x10xf32>
    %175 = arith.subf %169, %174 : vector<2x1x10xf32>
    %cst_79 = arith.constant dense<0xFF800000> : vector<2x1xf32>
    %176 = vector.multi_reduction <maximumf>, %165, %cst_79 [2] : vector<2x1x10xf32> to vector<2x1xf32>
    %177 = vector.shape_cast %176 : vector<2x1xf32> to vector<2x1x1xf32>
    %178 = vector.broadcast %177 : vector<2x1x1xf32> to vector<2x1x10xf32>
    %179 = arith.subf %165, %178 : vector<2x1x10xf32>
    %180 = math.exp %179 : vector<2x1x10xf32>
    %cst_80 = arith.constant dense<0.000000e+00> : vector<2x1xf32>
    %181 = vector.multi_reduction <add>, %180, %cst_80 [2] : vector<2x1x10xf32> to vector<2x1xf32>
    %182 = vector.shape_cast %181 : vector<2x1xf32> to vector<2x1x1xf32>
    %183 = math.log %182 : vector<2x1x1xf32>
    %184 = vector.broadcast %183 : vector<2x1x1xf32> to vector<2x1x10xf32>
    %185 = arith.subf %179, %184 : vector<2x1x10xf32>
    %186 = math.exp %185 : vector<2x1x10xf32>
    %187 = arith.subf %185, %175 : vector<2x1x10xf32>
    %188 = arith.mulf %186, %187 : vector<2x1x10xf32>
    %189 = vector.shape_cast %188 : vector<2x1x10xf32> to vector<1x2x1x10xf32>
    %cst_81 = arith.constant dense<0.000000e+00> : vector<1xf32>
    %190 = vector.multi_reduction <add>, %189, %cst_81 [1, 2, 3] : vector<1x2x1x10xf32> to vector<1xf32>
    %191 = vector.shape_cast %190 : vector<1xf32> to vector<1x1x1x1xf32>
    %192 = vector.extract %191[0, 0, 0, 0] : f32 from vector<1x1x1x1xf32>
    %c2_i32 = arith.constant 2 : i32
    %193 = arith.muli %arg0, %c2_i32 : i32
    %194 = tpu.iota {dimensions = array<i32: 1>} : vector<1x10xi32>
    %c0_i32 = arith.constant 0 : i32
    %195 = arith.addi %193, %c0_i32 : i32
    %196 = arith.index_cast %195 : i32 to index
    %197 = memref.load %arg1[%196] : memref<2xi32, #tpu.memory_space<smem>>
    %198 = vector.broadcast %197 : i32 to vector<1x10xi32>
    %199 = arith.cmpi eq, %194, %198 : vector<1x10xi32>
    %200 = arith.extui %199 : vector<1x10xi1> to vector<1x10xi32>
    %201 = arith.sitofp %200 : vector<1x10xi32> to vector<1x10xf32>
    %202 = vector.extract_strided_slice %175 {offsets = [0, 0, 0], sizes = [1, 1, 10], strides = [1, 1, 1]} : vector<2x1x10xf32> to vector<1x1x10xf32>
    %203 = vector.shape_cast %202 : vector<1x1x10xf32> to vector<1x10xf32>
    %204 = arith.mulf %203, %201 : vector<1x10xf32>
    %205 = vector.shape_cast %204 : vector<1x10xf32> to vector<1x1x10xf32>
    %cst_82 = arith.constant dense<0.000000e+00> : vector<1xf32>
    %206 = vector.multi_reduction <add>, %205, %cst_82 [1, 2] : vector<1x1x10xf32> to vector<1xf32>
    %207 = vector.shape_cast %206 : vector<1xf32> to vector<1x1x1xf32>
    %208 = vector.extract %207[0, 0, 0] : f32 from vector<1x1x1xf32>
    %cst_83 = arith.constant 0.000000e+00 : f32
    %209 = arith.subf %cst_83, %208 : f32
    %c1_i32 = arith.constant 1 : i32
    %210 = arith.addi %193, %c1_i32 : i32
    %211 = arith.index_cast %210 : i32 to index
    %212 = memref.load %arg1[%211] : memref<2xi32, #tpu.memory_space<smem>>
    %213 = vector.broadcast %212 : i32 to vector<1x10xi32>
    %214 = arith.cmpi eq, %194, %213 : vector<1x10xi32>
    %215 = arith.extui %214 : vector<1x10xi1> to vector<1x10xi32>
    %216 = arith.sitofp %215 : vector<1x10xi32> to vector<1x10xf32>
    %217 = vector.extract_strided_slice %175 {offsets = [1, 0, 0], sizes = [1, 1, 10], strides = [1, 1, 1]} : vector<2x1x10xf32> to vector<1x1x10xf32>
    %218 = vector.shape_cast %217 : vector<1x1x10xf32> to vector<1x10xf32>
    %219 = arith.mulf %218, %216 : vector<1x10xf32>
    %220 = vector.shape_cast %219 : vector<1x10xf32> to vector<1x1x10xf32>
    %cst_84 = arith.constant dense<0.000000e+00> : vector<1xf32>
    %221 = vector.multi_reduction <add>, %220, %cst_84 [1, 2] : vector<1x1x10xf32> to vector<1xf32>
    %222 = vector.shape_cast %221 : vector<1xf32> to vector<1x1x1xf32>
    %223 = vector.extract %222[0, 0, 0] : f32 from vector<1x1x1xf32>
    %224 = arith.subf %209, %223 : f32
    %225 = vector.broadcast %81 : f32 to vector<1x1x1xf32>
    %c0_85 = arith.constant 0 : index
    %c0_86 = arith.constant 0 : index
    %c0_87 = arith.constant 0 : index
    %226 = vector.load %arg10[%c0_85, %c0_86, %c0_87] : memref<1x1x1xf32, #tpu.memory_space<vmem>>, vector<1x1x1xf32>
    tpu.vector_store %arg10[%c0_85, %c0_86, %c0_87], %225 {strides = array<i32>} : memref<1x1x1xf32, #tpu.memory_space<vmem>>, vector<1x1x1xf32>,
    %227 = vector.broadcast %163 : f32 to vector<1x1x1xf32>
    %c0_88 = arith.constant 0 : index
    %c0_89 = arith.constant 0 : index
    %c0_90 = arith.constant 0 : index
    %228 = vector.load %arg11[%c0_88, %c0_89, %c0_90] : memref<1x1x1xf32, #tpu.memory_space<vmem>>, vector<1x1x1xf32>
    tpu.vector_store %arg11[%c0_88, %c0_89, %c0_90], %227 {strides = array<i32>} : memref<1x1x1xf32, #tpu.memory_space<vmem>>, vector<1x1x1xf32>,
    %229 = vector.broadcast %192 : f32 to vector<1x1x1xf32>
    %c0_91 = arith.constant 0 : index
    %c0_92 = arith.constant 0 : index
    %c0_93 = arith.constant 0 : index
    %230 = vector.load %arg12[%c0_91, %c0_92, %c0_93] : memref<1x1x1xf32, #tpu.memory_space<vmem>>, vector<1x1x1xf32>
    tpu.vector_store %arg12[%c0_91, %c0_92, %c0_93], %229 {strides = array<i32>} : memref<1x1x1xf32, #tpu.memory_space<vmem>>, vector<1x1x1xf32>,
    %231 = vector.broadcast %224 : f32 to vector<1x1x1xf32>
    %c0_94 = arith.constant 0 : index
    %c0_95 = arith.constant 0 : index
    %c0_96 = arith.constant 0 : index
    %232 = vector.load %arg13[%c0_94, %c0_95, %c0_96] : memref<1x1x1xf32, #tpu.memory_space<vmem>>, vector<1x1x1xf32>
    tpu.vector_store %arg13[%c0_94, %c0_95, %c0_96], %231 {strides = array<i32>} : memref<1x1x1xf32, #tpu.memory_space<vmem>>, vector<1x1x1xf32>,
    return
  }
  func.func @transform_0(%arg0: i32, %arg1: memref<2xi32, #tpu.memory_space<smem>>) -> (i32, i32, i32) {
    %c0_i32 = arith.constant 0 : i32
    %c0_i32_0 = arith.constant 0 : i32
    %c0_i32_1 = arith.constant 0 : i32
    return %arg0, %c0_i32, %c0_i32_0 : i32, i32, i32
  }
  func.func @transform_1(%arg0: i32, %arg1: memref<2xi32, #tpu.memory_space<smem>>) -> (i32, i32, i32) {
    %c0_i32 = arith.constant 0 : i32
    %c0_i32_0 = arith.constant 0 : i32
    %c0_i32_1 = arith.constant 0 : i32
    return %arg0, %c0_i32, %c0_i32_0 : i32, i32, i32
  }
  func.func @transform_2(%arg0: i32, %arg1: memref<2xi32, #tpu.memory_space<smem>>) -> (i32, i32) {
    %c0_i32 = arith.constant 0 : i32
    %c0_i32_0 = arith.constant 0 : i32
    %c0_i32_1 = arith.constant 0 : i32
    return %c0_i32, %c0_i32_0 : i32, i32
  }
  func.func @transform_3(%arg0: i32, %arg1: memref<2xi32, #tpu.memory_space<smem>>) -> (i32, i32, i32) {
    %c0_i32 = arith.constant 0 : i32
    %c0_i32_0 = arith.constant 0 : i32
    %c0_i32_1 = arith.constant 0 : i32
    return %arg0, %c0_i32, %c0_i32_0 : i32, i32, i32
  }
  func.func @transform_4(%arg0: i32, %arg1: memref<2xi32, #tpu.memory_space<smem>>) -> (i32, i32, i32) {
    %c0_i32 = arith.constant 0 : i32
    %c0_i32_0 = arith.constant 0 : i32
    %c0_i32_1 = arith.constant 0 : i32
    return %arg0, %c0_i32, %c0_i32_0 : i32, i32, i32
  }
  func.func @transform_5(%arg0: i32, %arg1: memref<2xi32, #tpu.memory_space<smem>>) -> (i32, i32) {
    %c0_i32 = arith.constant 0 : i32
    %c0_i32_0 = arith.constant 0 : i32
    %c0_i32_1 = arith.constant 0 : i32
    return %c0_i32, %c0_i32_0 : i32, i32
  }
  func.func @transform_6(%arg0: i32, %arg1: memref<2xi32, #tpu.memory_space<smem>>) -> (i32, i32, i32) {
    %c0_i32 = arith.constant 0 : i32
    %c0_i32_0 = arith.constant 0 : i32
    %c0_i32_1 = arith.constant 0 : i32
    return %arg0, %c0_i32, %c0_i32_0 : i32, i32, i32
  }
  func.func @transform_7(%arg0: i32, %arg1: memref<2xi32, #tpu.memory_space<smem>>) -> (i32, i32, i32) {
    %c0_i32 = arith.constant 0 : i32
    %c0_i32_0 = arith.constant 0 : i32
    %c0_i32_1 = arith.constant 0 : i32
    return %arg0, %c0_i32, %c0_i32_0 : i32, i32, i32
  }
  func.func @transform_8(%arg0: i32, %arg1: memref<2xi32, #tpu.memory_space<smem>>) -> (i32, i32, i32) {
    %c0_i32 = arith.constant 0 : i32
    %c0_i32_0 = arith.constant 0 : i32
    %c0_i32_1 = arith.constant 0 : i32
    return %arg0, %c0_i32, %c0_i32_0 : i32, i32, i32
  }
  func.func @transform_9(%arg0: i32, %arg1: memref<2xi32, #tpu.memory_space<smem>>) -> (i32, i32, i32) {
    %c0_i32 = arith.constant 0 : i32
    %c0_i32_0 = arith.constant 0 : i32
    %c0_i32_1 = arith.constant 0 : i32
    return %arg0, %c0_i32, %c0_i32_0 : i32, i32, i32
  }
  func.func @transform_10(%arg0: i32, %arg1: memref<2xi32, #tpu.memory_space<smem>>) -> (i32, i32, i32) {
    %c0_i32 = arith.constant 0 : i32
    %c0_i32_0 = arith.constant 0 : i32
    %c0_i32_1 = arith.constant 0 : i32
    return %arg0, %c0_i32, %c0_i32_0 : i32, i32, i32
  }
  func.func @transform_11(%arg0: i32, %arg1: memref<2xi32, #tpu.memory_space<smem>>) -> (i32, i32, i32) {
    %c0_i32 = arith.constant 0 : i32
    %c0_i32_0 = arith.constant 0 : i32
    %c0_i32_1 = arith.constant 0 : i32
    return %arg0, %c0_i32, %c0_i32_0 : i32, i32, i32
  }
}

</mosaic_0001>

<bundles_post_ra>
// kernel: tpu_custom_call.1
= control target key start
LH: loop header
LB: loop body
LE: loop exit
PB: predicated region body
PF: predicated region fallthrough
CT: control target
= control target key end

     0   :  { %s1280_s24 = smov [#allocation3]   ;;  %s1831_s0 = inlined_call_operand.vmem [shape: s32[2], index: 0, kind: input, shape index: {}]   ;;  %s1832_s1 = inlined_call_operand.vmem [shape: f32[2,8,256], index: 1, kind: input, shape index: {}]   ;;  %s1833_s2 = inlined_call_operand.vmem [shape: f32[2,16,64], index: 2, kind: input, shape index: {}]   ;;  %s1834_s3 = inlined_call_operand.vmem [shape: f32[256,64], index: 3, kind: input, shape index: {}]   ;;  %s1835_s4 = inlined_call_operand.vmem [shape: f32[2,16,64], index: 4, kind: input, shape index: {}]   ;;  %s1836_s5 = inlined_call_operand.vmem [shape: f32[2,32,256], index: 5, kind: input, shape index: {}]   ;;  %s1837_s6 = inlined_call_operand.vmem [shape: f32[256,64], index: 6, kind: input, shape index: {}]   ;;  %s1838_s7 = inlined_call_operand.vmem [shape: f32[2,1,10], index: 7, kind: input, shape index: {}]   ;;  %s1839_s8 = inlined_call_operand.vmem [shape: f32[2,1,10], index: 8, kind: input, shape index: {}]   ;;  %s1840_s9 = inlined_call_operand.hbm [shape: f32[1,1,1], index: 9, kind: output, shape index: {0}]   ;;  %s1841_s10 = inlined_call_operand.hbm [shape: f32[1,1,1], index: 10, kind: output, shape index: {1}]   ;;  %s1842_s11 = inlined_call_operand.hbm [shape: f32[1,1,1], index: 11, kind: output, shape index: {2}]   ;;  %s1843_s12 = inlined_call_operand.hbm [shape: f32[1,1,1], index: 12, kind: output, shape index: {3}]  }
   0x1   :  { %s19_s23 = sshll.u32 %s1831_s0, 4  ;;  %s20_s23 = int_to_ptr.vmem [resolvable:$true] %s19_s23 }
   0x2   :  { %22 = dma.vmem_to_smem %s20_s23, 16, %s1280_s24, [#allocation2] }
   0x3   :  { %1272 = dma.done.wait [#allocation2], 16 }
   0x4   :  { %1273 = vsyncadd [#allocation2], 4294967280 }
   0x5   :  { %25 = sfence }
   0x6   :  { %26 = vsyncpa [#allocation5], 0 }
   0x7   :  { %27 = vsyncpa [#allocation7], 0  ;;  %v62_v0 = vld [vmem:[%s1834_s3 + $0x78] sm:$0xff]  ;;  %v61_v2 = vld [vmem:[%s1834_s3 + $0x70] sm:$0xff] }
   0x8   :  { %v78_v1 = vld [vmem:[%s1834_s3 + $0xf8] sm:$0xff]  ;;  %79 = vmatpush.msra.mxu0 %v62_v0  ;;  %v77_v3 = vld [vmem:[%s1834_s3 + $0xf0] sm:$0xff]  ;;  %v60_v4 = vld [vmem:[%s1834_s3 + $0x68] sm:$0xff]  ;;  %258 = vmatpush.msra.mxu2 %v62_v0 }
   0x9   :  { %99 = vmatpush.msra.mxu1 %v78_v1  ;;  %v76_v5 = vld [vmem:[%s1834_s3 + $0xe8] sm:$0xff]  ;;  %278 = vmatpush.msra.mxu3 %v78_v1  ;;  %v59_v6 = vld [vmem:[%s1834_s3 + $0x60] sm:$0xff]  ;;  %v58_v8 = vld [vmem:[%s1834_s3 + $0x58] sm:$0xff] }
   0xa   :  { %80 = vmatpush.msra.mxu0 %v61_v2  ;;  %v75_v7 = vld [vmem:[%s1834_s3 + $0xe0] sm:$0xff]  ;;  %259 = vmatpush.msra.mxu2 %v61_v2  ;;  %v74_v9 = vld [vmem:[%s1834_s3 + $0xd8] sm:$0xff]  ;;  %v57_v10 = vld [vmem:[%s1834_s3 + $0x50] sm:$0xff] }
   0xb   :  { %100 = vmatpush.msra.mxu1 %v77_v3  ;;  %279 = vmatpush.msra.mxu3 %v77_v3  ;;  %v73_v11 = vld [vmem:[%s1834_s3 + $0xd0] sm:$0xff]  ;;  %v56_v12 = vld [vmem:[%s1834_s3 + $0x48] sm:$0xff] }
   0xc   :  { %81 = vmatpush.msra.mxu0 %v60_v4  ;;  %260 = vmatpush.msra.mxu2 %v60_v4  ;;  %v72_v13 = vld [vmem:[%s1834_s3 + $0xc8] sm:$0xff] }
   0xd   :  { %101 = vmatpush.msra.mxu1 %v76_v5  ;;  %280 = vmatpush.msra.mxu3 %v76_v5 }
   0xe   :  { %82 = vmatpush.msra.mxu0 %v59_v6  ;;  %261 = vmatpush.msra.mxu2 %v59_v6 }
   0xf   :  { %102 = vmatpush.msra.mxu1 %v75_v7  ;;  %281 = vmatpush.msra.mxu3 %v75_v7 }
  0x10   :  { %83 = vmatpush.msra.mxu0 %v58_v8  ;;  %262 = vmatpush.msra.mxu2 %v58_v8 }
  0x11   :  { %103 = vmatpush.msra.mxu1 %v74_v9  ;;  %282 = vmatpush.msra.mxu3 %v74_v9 }
  0x12   :  { %84 = vmatpush.msra.mxu0 %v57_v10 }
  0x13   :  { %104 = vmatpush.msra.mxu1 %v73_v11 }
  0x14   :  { %28 = vsyncpa [#allocation10], 0  ;;  %v55_v14 = vld [vmem:[%s1834_s3 + $0x40] sm:$0xff]  ;;  %263 = vmatpush.msra.mxu2 %v57_v10  ;;  %283 = vmatpush.msra.mxu3 %v73_v11  ;;  %v54_v16 = vld [vmem:[%s1834_s3 + $0x38] sm:$0xff]  ;;  %v1281_v34 = vmov 8.0   ;;  %v1282_v39 = vmov 16.0  }
  0x15   :  { %v71_v15 = vld [vmem:[%s1834_s3 + $0xc0] sm:$0xff]  ;;  %85 = vmatpush.msra.mxu0 %v56_v12  ;;  %105 = vmatpush.msra.mxu1 %v72_v13  ;;  %v70_v17 = vld [vmem:[%s1834_s3 + $0xb8] sm:$0xff]  ;;  %v53_v18 = vld [vmem:[%s1834_s3 + $0x30] sm:$0xff]  ;;  %1106 = vrcp.f32 %v1281_v34  ;;  %vm122_vm0 = vcmask 523264   ;;  %vm158_vm3 = vcmask 516096   ;;  %s988_s21 = sshll.u32 %s1841_s10, 4  ;;  %s989_s21 = int_to_ptr.hbm [resolvable:$true] %s988_s21 }
  0x16   :  { %264 = vmatpush.msra.mxu2 %v56_v12  ;;  %284 = vmatpush.msra.mxu3 %v72_v13  ;;  %v69_v19 = vld [vmem:[%s1834_s3 + $0xb0] sm:$0xff]  ;;  %v52_v20 = vld [vmem:[%s1834_s3 + $0x28] sm:$0xff]  ;;  %v51_v22 = vld [vmem:[%s1834_s3 + $0x20] sm:$0xff]  ;;  %1108 = vrcp.f32 %v1282_v39  ;;  %s1283_s26 = smov 1e-12   ;;  %s1288_s22 = smov [#allocation8]  }
  0x17   :  { %86 = vmatpush.msra.mxu0 %v55_v14  ;;  %106 = vmatpush.msra.mxu1 %v71_v15  ;;  %v68_v21 = vld [vmem:[%s1834_s3 + $0xa8] sm:$0xff]  ;;  %v67_v23 = vld [vmem:[%s1834_s3 + $0xa0] sm:$0xff]  ;;  %v50_v24 = vld [vmem:[%s1834_s3 + $0x18] sm:$0xff]  ;;  %s997_s23 = sshll.u32 %s1288_s22, 4  ;;  %s998_s23 = int_to_ptr.vmem [resolvable:$true] %s997_s23 }
  0x18   :  { %265 = vmatpush.msra.mxu2 %v55_v14  ;;  %285 = vmatpush.msra.mxu3 %v71_v15  ;;  %v66_v25 = vld [vmem:[%s1834_s3 + $0x98] sm:$0xff]  ;;  %v49_v26 = vld [vmem:[%s1834_s3 + $0x10] sm:$0xff]  ;;  %v48_v28 = vld [vmem:[%s1834_s3 + $0x8] sm:$0xff] }
  0x19   :  { %87 = vmatpush.msra.mxu0 %v54_v16  ;;  %107 = vmatpush.msra.mxu1 %v70_v17  ;;  %v65_v27 = vld [vmem:[%s1834_s3 + $0x90] sm:$0xff]  ;;  %v64_v29 = vld [vmem:[%s1834_s3 + $0x88] sm:$0xff]  ;;  %v47_v30 = vld [vmem:[%s1834_s3] sm:$0xff] }
  0x1a   :  { %266 = vmatpush.msra.mxu2 %v54_v16  ;;  %286 = vmatpush.msra.mxu3 %v70_v17  ;;  %v63_v31 = vld [vmem:[%s1834_s3 + $0x80] sm:$0xff]  ;;  %v46_v33 = vld [vmem:[%s1832_s1 + $0x8] sm:$0xff] }
  0x1b   :  { %88 = vmatpush.msra.mxu0 %v53_v18  ;;  %108 = vmatpush.msra.mxu1 %v69_v19  ;;  %v45_v32 = vld [vmem:[%s1832_s1] sm:$0xff]  ;;  %v120_v36 = vld [vmem:[%s1833_s2 + $0x8] sm:$0xff]  ;;  %v1107_v43 = vpop.eup %1106 }
  0x1c   :  { %267 = vmatpush.msra.mxu2 %v53_v18  ;;  %287 = vmatpush.msra.mxu3 %v69_v19  ;;  %v119_v35 = vld [vmem:[%s1833_s2] sm:$0xff]  ;;  %v139_v38 = vmul.f32 %v120_v36, %v120_v36  ;;  %v1109_v45 = vpop.eup %1108  ;;  %v131_v46 = vmul.f32 8.0, %v1107_v43  ;;  %vm135_vm1 = vweird.f32 %v1107_v43 }
  0x1d   :  { %89 = vmatpush.msra.mxu0 %v52_v20  ;;  %109 = vmatpush.msra.mxu1 %v68_v21  ;;  %v138_v37 = vmul.f32 %v119_v35, %v119_v35  ;;  %v150_v51 = vmul.f32 16.0, %v1109_v45  ;;  %vm154_vm2 = vweird.f32 %v1109_v45 }
  0x1e   :  { %268 = vmatpush.msra.mxu2 %v52_v20  ;;  %288 = vmatpush.msra.mxu3 %v68_v21  ;;  %v141_v41 = vsel %vm122_vm0, %v139_v38, 0.0  ;;  %v132_v53 = vsub.f32 1.0, %v131_v46  ;;  %v1033_v21 = vld [vmem:[%s1832_s1 + $0x10] sm:$0xff] }
  0x1f   :  { %90 = vmatpush.msra.mxu0 %v51_v22  ;;  %110 = vmatpush.msra.mxu1 %v67_v23  ;;  %v140_v40 = vsel %vm122_vm0, %v138_v37, 0.0  ;;  %v151_v56 = vsub.f32 1.0, %v150_v51 }
  0x20   :  { %269 = vmatpush.msra.mxu2 %v51_v22  ;;  %289 = vmatpush.msra.mxu3 %v67_v23  ;;  %v142_v42 = vadd.f32 %v141_v41, %v140_v40  ;;  %v133_v58 = vmul.f32 %v1107_v43, %v132_v53  ;;  %v1034_v22 = vld [vmem:[%s1832_s1 + $0x18] sm:$0xff] }
  0x21   :  { %91 = vmatpush.msra.mxu0 %v50_v24  ;;  %111 = vmatpush.msra.mxu1 %v66_v25  ;;  %v152_v61 = vmul.f32 %v1109_v45, %v151_v56 }
  0x22   :  { %270 = vmatpush.msra.mxu2 %v50_v24  ;;  %290 = vmatpush.msra.mxu3 %v66_v25  ;;  %v143_v44 = vrot.slane %v142_v42, 4  ;;  %v134_v63 = vadd.f32 %v1107_v43, %v133_v58 }
  0x23   :  { %92 = vmatpush.msra.mxu0 %v49_v26  ;;  %112 = vmatpush.msra.mxu1 %v65_v27  ;;  %v153_v2 = vadd.f32 %v1109_v45, %v152_v61 }
  0x24   :  { %271 = vmatpush.msra.mxu2 %v49_v26  ;;  %291 = vmatpush.msra.mxu3 %v65_v27  ;;  %v144_v49 = vadd.f32 %v143_v44, %v142_v42  ;;  %v1469_v4 = vsel %vm135_vm1, %v1107_v43, %v134_v63  ;;  %v1035_v63 = vld [vmem:[%s1833_s2 + $0x10] sm:$0xff] }
  0x25   :  { %93 = vmatpush.msra.mxu0 %v48_v28  ;;  %113 = vmatpush.msra.mxu1 %v64_v29  ;;  %v1471_v7 = vsel %vm154_vm2, %v1109_v45, %v153_v2 }
  0x26   :  { %272 = vmatpush.msra.mxu2 %v48_v28  ;;  %292 = vmatpush.msra.mxu3 %v64_v29  ;;  %v145_v54 = vrot.slane %v144_v49, 2 }
  0x27   :  { %94 = vmatpush.msra.mxu0 %v47_v30  ;;  %114 = vmatpush.msra.mxu1 %v63_v31 }
  0x28   :  { %95 = vmatmul.f32.vlgmr.msra.gmra.mxu0 %v45_v32  ;;  %115 = vmatmul.f32.vlgmr.msra.gmra.mxu1 %v46_v33  ;;  %v146_v60 = vadd.f32 %v145_v54, %v144_v49 }
  0x29   :  { %273 = vmatpush.msra.mxu2 %v47_v30  ;;  %293 = vmatpush.msra.mxu3 %v63_v31 }
  0x2a   :  { %v147_v1 = vrot.slane %v146_v60, 1  ;;  %274 = vmatmul.f32.vlgmr.msra.gmra.mxu2 %v1033_v21  ;;  %294 = vmatmul.f32.vlgmr.msra.gmra.mxu3 %v1034_v22 }
  0x2c   :  { %v148_v6 = vadd.f32 %v147_v1, %v146_v60  ;;  %v310_v1 = vmul.f32 %v1035_v63, %v1035_v63  ;;  %v443_v63 = vld [vmem:[%s1837_s6 + $0x70] sm:$0xff] }
  0x2e   :  { %v1479_v10 = vmul.f32 %v1471_v7, %v148_v6  ;;  %v312_v6 = vsel %vm122_vm0, %v310_v1, 0.0  ;;  %v442_v1 = vld [vmem:[%s1837_s6 + $0x68] sm:$0xff] }
  0x30   :  { %v200_v12 = vmul.f32 %v1479_v10, %v1479_v10 }
  0x32   :  { %v201_v13 = vsel %vm158_vm3, %v200_v12, 0.0 }
  0xa5   :  { %v96_v47 = vpop.f32.mrf.mxu0  ;;  %v116_v48 = vpop.f32.mrf.mxu1 }
  0xa6   :  { %v117_v50 = vadd.f32 %v116_v48, %v96_v47 }
  0xa8   :  { %v121_v52 = vmul.f32 %v117_v50, %v117_v50 }
  0xaa   :  { %v123_v55 = vsel %vm122_vm0, %v121_v52, 0.0 }
  0xab   :  { %v124_v57 = vrot.slane %v123_v55, 4 }
  0xad   :  { %v125_v59 = vadd.f32 %v124_v57, %v123_v55  ;;  %v275_v53 = vpop.f32.mrf.mxu2  ;;  %v295_v54 = vpop.f32.mrf.mxu3 }
  0xae   :  { %v296_v55 = vadd.f32 %v295_v54, %v275_v53 }
  0xaf   :  { %v126_v62 = vrot.slane %v125_v59, 2 }
  0xb0   :  { %v301_v57 = vmul.f32 %v296_v55, %v296_v55 }
  0xb1   :  { %v127_v0 = vadd.f32 %v126_v62, %v125_v59 }
  0xb2   :  { %v302_v59 = vsel %vm122_vm0, %v301_v57, 0.0 }
  0xb3   :  { %v128_v3 = vrot.slane %v127_v0, 1  ;;  %v303_v62 = vrot.slane %v302_v59, 4 }
  0xb5   :  { %v129_v5 = vadd.f32 %v128_v3, %v127_v0  ;;  %v1036_v0 = vld [vmem:[%s1833_s2 + $0x18] sm:$0xff] }
  0xb6   :  { %v311_v2 = vmul.f32 %v1036_v0, %v1036_v0  ;;  %v459_v0 = vld [vmem:[%s1837_s6 + $0xf0] sm:$0xff] }
  0xb7   :  { %v1474_v8 = vmul.f32 %v1469_v4, %v129_v5  ;;  %v304_v5 = vadd.f32 %v303_v62, %v302_v59  ;;  %v460_v62 = vld [vmem:[%s1837_s6 + $0xf8] sm:$0xff] }
  0xb8   :  { %490 = vmatpush.msrb.mxu1 %v460_v62  ;;  %694 = vmatpush.msrb.mxu3 %v460_v62 }
  0xb9   :  { %v157_v9 = vmul.f32 %v1474_v8, %v1474_v8 }
  0xba   :  { %491 = vmatpush.msrb.mxu1 %v459_v0  ;;  %695 = vmatpush.msrb.mxu3 %v459_v0 }
  0xbb   :  { %v159_v11 = vsel %vm158_vm3, %v157_v9, 0.0  ;;  %v313_v9 = vsel %vm122_vm0, %v311_v2, 0.0  ;;  %v458_v2 = vld [vmem:[%s1837_s6 + $0xe8] sm:$0xff] }
  0xbc   :  { %160 = vadd.xlane.f32.xlu0 %v159_v11  ;;  %v314_v11 = vadd.f32 %v313_v9, %v312_v6  ;;  %492 = vmatpush.msrb.mxu1 %v458_v2  ;;  %v440_v6 = vld [vmem:[%s1837_s6 + $0x58] sm:$0xff] }
  0xbd   :  { %v456_v9 = vld [vmem:[%s1837_s6 + $0xd8] sm:$0xff]  ;;  %696 = vmatpush.msrb.mxu3 %v458_v2 }
  0xc4   :  { %202 = vadd.xlane.f32.xlu0 %v201_v13 }
 0x12f   :  { %v161_v14 = vpop.xlane.xlu0 %160 }
 0x130   :  { %v162_v15 = vrot.slane %v161_v14, 4 }
 0x132   :  { %v163_v16 = vadd.f32 %v162_v15, %v161_v14  ;;  %v315_v14 = vrot.slane %v314_v11, 4 }
 0x134   :  { %v164_v17 = vrot.slane %v163_v16, 2 }
 0x136   :  { %v165_v18 = vadd.f32 %v164_v17, %v163_v16  ;;  %v305_v16 = vrot.slane %v304_v5, 2 }
 0x137   :  { %v203_v23 = vpop.xlane.xlu0 %202 }
 0x138   :  { %v166_v19 = vrot.slane %v165_v18, 1  ;;  %v204_v25 = vrot.slane %v203_v23, 4 }
 0x13a   :  { %v167_v20 = vadd.f32 %v166_v19, %v165_v18  ;;  %v205_v26 = vadd.f32 %v204_v25, %v203_v23  ;;  %v316_v18 = vadd.f32 %v315_v14, %v314_v11  ;;  %v439_v11 = vld [vmem:[%s1837_s6 + $0x50] sm:$0xff]  ;;  %v454_v14 = vld [vmem:[%s1837_s6 + $0xc8] sm:$0xff] }
 0x13b   :  { %v435_v19 = vld [vmem:[%s1837_s6 + $0x30] sm:$0xff] }
 0x13c   :  { %1050 = vpush %v167_v20  ;;  %v206_v29 = vrot.slane %v205_v26, 2 }
 0x13e   :  { %v207_v32 = vadd.f32 %v206_v29, %v205_v26 }
 0x140   :  { %v208_v35 = vrot.slane %v207_v32, 1 }
 0x142   :  { %v209_v40 = vadd.f32 %v208_v35, %v207_v32 }
 0x16d   :  { %s1051_s24 = spop %1050 }
 0x16e   :  { %v169_v24 = vstv %s1051_s24 }
 0x16f   :  { %1110 = vrsqrt.f32 %v169_v24  ;;  %vm177_vm4 = vcmp.eq.f32.partialorder %v169_v24, inf  ;;  %v180_v37 = vand.u32 2147483648, %v169_v24  ;;  %vm179_vm5 = vcmp.eq.f32.partialorder %v169_v24, 0.0 }
 0x175   :  { %v1111_v27 = vpop.eup %1110 }
 0x176   :  { %v171_v28 = vmul.f32 %v1111_v27, %v169_v24 }
 0x178   :  { %v172_v30 = vmul.f32 %v1111_v27, %v171_v28 }
 0x17a   :  { %v173_v31 = vmul.f32 0.5, %v172_v30 }
 0x17c   :  { %v174_v33 = vsub.f32 1.5, %v173_v31 }
 0x17e   :  { %v175_v34 = vmul.f32 %v1111_v27, %v174_v33  ;;  %v306_v27 = vadd.f32 %v305_v16, %v304_v5  ;;  %v457_v5 = vld [vmem:[%s1837_s6 + $0xe0] sm:$0xff] }
 0x17f   :  { %493 = vmatpush.msrb.mxu1 %v457_v5  ;;  %697 = vmatpush.msrb.mxu3 %v457_v5  ;;  %v453_v16 = vld [vmem:[%s1837_s6 + $0xc0] sm:$0xff] }
 0x180   :  { %v176_v36 = vmul.f32 %v175_v34, %v169_v24  ;;  %v307_v34 = vrot.slane %v306_v27, 1 }
 0x181   :  { %494 = vmatpush.msrb.mxu1 %v456_v9  ;;  %698 = vmatpush.msrb.mxu3 %v456_v9  ;;  %v420_v9 = vld [vmem:[%s1835_s4 + $0x8] sm:$0xff] }
 0x182   :  { %v178_v38 = vsel %vm177_vm4, %v169_v24, %v176_v36  ;;  %v317_v24 = vrot.slane %v316_v18, 2 }
 0x183   :  { %v181_v39 = vsel %vm179_vm5, %v180_v37, %v178_v38 }
 0x184   :  { %1052 = vpush %v181_v39  ;;  %v318_v29 = vadd.f32 %v317_v24, %v316_v18  ;;  %v452_v18 = vld [vmem:[%s1837_s6 + $0xb8] sm:$0xff]  ;;  %v449_v24 = vld [vmem:[%s1837_s6 + $0xa0] sm:$0xff] }
 0x185   :  { %1054 = vpush %v209_v40 }
 0x186   :  { %v319_v33 = vrot.slane %v318_v29, 1 }
 0x188   :  { %v320_v37 = vadd.f32 %v319_v33, %v318_v29 }
 0x18a   :  { %v1511_v40 = vmul.f32 %v320_v37, %v1471_v7  ;;  %v422_v37 = vld [vmem:[%s1836_s5 + $0x8] sm:$0xff] }
 0x1b5   :  { %s1053_s1 = spop %1052 }
 0x1b6   :  { %s1055_s25 = spop %1054  ;;  %s183_s27 = smax.f32 %s1283_s26, %s1053_s1 }
 0x1b7   :  { %v211_v41 = vstv %s1055_s25  ;;  %v184_v52 = vstv %s183_s27 }
 0x1b8   :  { %1112 = vrsqrt.f32 %v211_v41  ;;  %vm219_vm6 = vcmp.eq.f32.partialorder %v211_v41, inf  ;;  %v222_v49 = vand.u32 2147483648, %v211_v41  ;;  %vm221_vm7 = vcmp.eq.f32.partialorder %v211_v41, 0.0 }
 0x1b9   :  { %1114 = vrcp.f32 %v184_v52  ;;  %vm190_vm9 = vweird.f32 %v184_v52  ;;  %v196_v17 = vand.u32 2147483648, %v184_v52  ;;  %v194_v20 = vand.u32 2147483647, %v184_v52 }
 0x1bb   :  { %v197_v28 = vor.u32 1.1754944e-38, %v196_v17  ;;  %vm195_vm13 = vcmp.eq.f32.partialorder %v194_v20, 8.507059e+37  ;;  %v436_v17 = vld [vmem:[%s1837_s6 + $0x38] sm:$0xff]  ;;  %v451_v20 = vld [vmem:[%s1837_s6 + $0xb0] sm:$0xff] }
 0x1be   :  { %v1113_v42 = vpop.eup %1112 }
 0x1bf   :  { %v213_v43 = vmul.f32 %v1113_v42, %v211_v41  ;;  %v1115_v56 = vpop.eup %1114 }
 0x1c0   :  { %v186_v58 = vmul.f32 %v1115_v56, %v184_v52  ;;  %vm191_vm8 = vweird.f32 %v1115_v56 }
 0x1c1   :  { %v214_v44 = vmul.f32 %v1113_v42, %v213_v43  ;;  %vm1502_vm10 = vmor %vm190_vm9, %vm191_vm8  ;;  %v364_v43 = vmul.f32 %v1511_v40, %v1511_v40 }
 0x1c2   :  { %v187_v60 = vsub.f32 1.0, %v186_v58 }
 0x1c3   :  { %v215_v45 = vmul.f32 0.5, %v214_v44 }
 0x1c4   :  { %v188_v3 = vmul.f32 %v1115_v56, %v187_v60 }
 0x1c5   :  { %v216_v46 = vsub.f32 1.5, %v215_v45  ;;  %v365_v45 = vsel %vm158_vm3, %v364_v43, 0.0 }
 0x1c6   :  { %v189_v13 = vadd.f32 %v1115_v56, %v188_v3  ;;  %366 = vadd.xlane.f32.xlu2 %v365_v45  ;;  %v441_v3 = vld [vmem:[%s1837_s6 + $0x60] sm:$0xff]  ;;  %v424_v45 = vld [vmem:[%s1836_s5 + $0x18] sm:$0xff] }
 0x1c7   :  { %v217_v47 = vmul.f32 %v1113_v42, %v216_v46  ;;  %v308_v42 = vadd.f32 %v307_v34, %v306_v27  ;;  %v431_v27 = vld [vmem:[%s1837_s6 + $0x10] sm:$0xff]  ;;  %v429_v34 = vld [vmem:[%s1837_s6] sm:$0xff] }
 0x1c8   :  { %v193_v23 = vsel %vm1502_vm10, %v1115_v56, %v189_v13  ;;  %v438_v13 = vld [vmem:[%s1837_s6 + $0x48] sm:$0xff] }
 0x1c9   :  { %v218_v48 = vmul.f32 %v217_v47, %v211_v41  ;;  %v198_v32 = vsel %vm195_vm13, %v197_v28, %v193_v23  ;;  %v1518_v47 = vmul.f32 %v308_v42, %v1469_v4  ;;  %v433_v23 = vld [vmem:[%s1837_s6 + $0x20] sm:$0xff]  ;;  %v447_v28 = vld [vmem:[%s1837_s6 + $0x90] sm:$0xff] }
 0x1ca   :  { %v199_v38 = vmul.f32 %v198_v32, %v1474_v8 }
 0x1cb   :  { %v220_v50 = vsel %vm219_vm6, %v211_v41, %v218_v48  ;;  %v322_v8 = vmul.f32 %v1518_v47, %v1518_v47 }
 0x1cc   :  { %v223_v51 = vsel %vm221_vm7, %v222_v49, %v220_v50 }
 0x1cd   :  { %1056 = vpush %v223_v51 }
 0x1fe   :  { %s1057_s28 = spop %1056 }
 0x1ff   :  { %s225_s29 = smax.f32 %s1283_s26, %s1057_s28 }
 0x200   :  { %v226_v61 = vstv %s225_s29 }
 0x201   :  { %1116 = vrcp.f32 %v226_v61  ;;  %v238_v22 = vand.u32 2147483648, %v226_v61  ;;  %v236_v26 = vand.u32 2147483647, %v226_v61  ;;  %vm232_vm12 = vweird.f32 %v226_v61 }
 0x203   :  { %v239_v31 = vor.u32 1.1754944e-38, %v238_v22  ;;  %vm237_vm15 = vcmp.eq.f32.partialorder %v236_v26, 8.507059e+37  ;;  %v450_v22 = vld [vmem:[%s1837_s6 + $0xa8] sm:$0xff]  ;;  %v448_v26 = vld [vmem:[%s1837_s6 + $0x98] sm:$0xff] }
 0x207   :  { %v1117_v12 = vpop.eup %1116 }
 0x208   :  { %v228_v15 = vmul.f32 %v1117_v12, %v226_v61  ;;  %vm233_vm11 = vweird.f32 %v1117_v12  ;;  %v444_v61 = vld [vmem:[%s1837_s6 + $0x78] sm:$0xff] }
 0x209   :  { %vm234_vm14 = vmor %vm232_vm12, %vm233_vm11  ;;  %461 = vmatpush.msrb.mxu0 %v444_v61  ;;  %665 = vmatpush.msrb.mxu2 %v444_v61 }
 0x20a   :  { %v229_v21 = vsub.f32 1.0, %v228_v15  ;;  %v437_v15 = vld [vmem:[%s1837_s6 + $0x40] sm:$0xff] }
 0x20b   :  { %462 = vmatpush.msrb.mxu0 %v443_v63  ;;  %666 = vmatpush.msrb.mxu2 %v443_v63 }
 0x20c   :  { %v230_v25 = vmul.f32 %v1117_v12, %v229_v21  ;;  %v434_v21 = vld [vmem:[%s1837_s6 + $0x28] sm:$0xff] }
 0x20d   :  { %463 = vmatpush.msrb.mxu0 %v442_v1  ;;  %667 = vmatpush.msrb.mxu2 %v442_v1 }
 0x20e   :  { %v231_v30 = vadd.f32 %v1117_v12, %v230_v25  ;;  %v432_v25 = vld [vmem:[%s1837_s6 + $0x18] sm:$0xff] }
 0x20f   :  { %464 = vmatpush.msrb.mxu0 %v441_v3  ;;  %668 = vmatpush.msrb.mxu2 %v441_v3 }
 0x210   :  { %v235_v35 = vsel %vm234_vm14, %v1117_v12, %v231_v30  ;;  %v455_v12 = vld [vmem:[%s1837_s6 + $0xd0] sm:$0xff]  ;;  %v430_v30 = vld [vmem:[%s1837_s6 + $0x8] sm:$0xff] }
 0x211   :  { %v240_v36 = vsel %vm237_vm15, %v239_v31, %v235_v35  ;;  %465 = vmatpush.msrb.mxu0 %v440_v6  ;;  %669 = vmatpush.msrb.mxu2 %v440_v6  ;;  %v446_v31 = vld [vmem:[%s1837_s6 + $0x88] sm:$0xff]  ;;  %v445_v35 = vld [vmem:[%s1837_s6 + $0x80] sm:$0xff]  ;;  %vm962_vm15 = vcmask 0  }
 0x212   :  { %v241_v39 = vmul.f32 %v240_v36, %v1479_v10  ;;  %v323_v10 = vsel %vm158_vm3, %v322_v8, 0.0  ;;  %495 = vmatpush.msrb.mxu1 %v455_v12  ;;  %699 = vmatpush.msrb.mxu3 %v455_v12  ;;  %v421_v36 = vld [vmem:[%s1836_s5] sm:$0xff]  ;;  %v520_v12 = vmul.f32 %v420_v9, %v420_v9 }
 0x213   :  { %466 = vmatpush.msrb.mxu0 %v439_v11  ;;  %670 = vmatpush.msrb.mxu2 %v439_v11  ;;  %v419_v6 = vld [vmem:[%s1835_s4] sm:$0xff] }
 0x214   :  { %v242_v41 = vsub.f32 %v199_v38, %v241_v39  ;;  %496 = vmatpush.msrb.mxu1 %v454_v14  ;;  %700 = vmatpush.msrb.mxu3 %v454_v14  ;;  %v519_v11 = vmul.f32 %v419_v6, %v419_v6  ;;  %v522_v14 = vsel %vm122_vm0, %v520_v12, 0.0 }
 0x215   :  { %467 = vmatpush.msrb.mxu0 %v438_v13  ;;  %671 = vmatpush.msrb.mxu2 %v438_v13 }
 0x216   :  { %v243_v44 = vmul.f32 %v242_v41, %v242_v41  ;;  %497 = vmatpush.msrb.mxu1 %v453_v16  ;;  %701 = vmatpush.msrb.mxu3 %v453_v16  ;;  %v521_v13 = vsel %vm122_vm0, %v519_v11, 0.0 }
 0x217   :  { %468 = vmatpush.msrb.mxu0 %v437_v15  ;;  %672 = vmatpush.msrb.mxu2 %v437_v15  ;;  %v523_v15 = vadd.f32 %v522_v14, %v521_v13 }
 0x218   :  { %v244_v46 = vsel %vm158_vm3, %v243_v44, 0.0  ;;  %498 = vmatpush.msrb.mxu1 %v452_v18  ;;  %702 = vmatpush.msrb.mxu3 %v452_v18  ;;  %v423_v44 = vld [vmem:[%s1836_s5 + $0x10] sm:$0xff] }
 0x219   :  { %245 = vadd.xlane.f32.xlu1 %v244_v46  ;;  %469 = vmatpush.msrb.mxu0 %v436_v17  ;;  %v524_v16 = vrot.slane %v523_v15, 4 }
 0x21a   :  { %673 = vmatpush.msrb.mxu2 %v436_v17  ;;  %499 = vmatpush.msrb.mxu1 %v451_v20 }
 0x21b   :  { %470 = vmatpush.msrb.mxu0 %v435_v19  ;;  %703 = vmatpush.msrb.mxu3 %v451_v20  ;;  %v525_v17 = vadd.f32 %v524_v16, %v523_v15 }
 0x21c   :  { %674 = vmatpush.msrb.mxu2 %v435_v19  ;;  %500 = vmatpush.msrb.mxu1 %v450_v22 }
 0x21d   :  { %471 = vmatpush.msrb.mxu0 %v434_v21  ;;  %704 = vmatpush.msrb.mxu3 %v450_v22  ;;  %v526_v18 = vrot.slane %v525_v17, 2 }
 0x21e   :  { %675 = vmatpush.msrb.mxu2 %v434_v21  ;;  %501 = vmatpush.msrb.mxu1 %v449_v24 }
 0x21f   :  { %472 = vmatpush.msrb.mxu0 %v433_v23  ;;  %705 = vmatpush.msrb.mxu3 %v449_v24  ;;  %v527_v19 = vadd.f32 %v526_v18, %v525_v17 }
 0x220   :  { %676 = vmatpush.msrb.mxu2 %v433_v23  ;;  %502 = vmatpush.msrb.mxu1 %v448_v26 }
 0x221   :  { %324 = vadd.xlane.f32.xlu1 %v323_v10  ;;  %473 = vmatpush.msrb.mxu0 %v432_v25  ;;  %v528_v20 = vrot.slane %v527_v19, 1 }
 0x222   :  { %677 = vmatpush.msrb.mxu2 %v432_v25  ;;  %706 = vmatpush.msrb.mxu3 %v448_v26 }
 0x223   :  { %474 = vmatpush.msrb.mxu0 %v431_v27  ;;  %503 = vmatpush.msrb.mxu1 %v447_v28  ;;  %v529_v21 = vadd.f32 %v528_v20, %v527_v19 }
 0x224   :  { %678 = vmatpush.msrb.mxu2 %v431_v27  ;;  %707 = vmatpush.msrb.mxu3 %v447_v28 }
 0x225   :  { %475 = vmatpush.msrb.mxu0 %v430_v30  ;;  %504 = vmatpush.msrb.mxu1 %v446_v31  ;;  %v1658_v22 = vmul.f32 %v529_v21, %v1471_v7 }
 0x226   :  { %679 = vmatpush.msrb.mxu2 %v430_v30  ;;  %708 = vmatpush.msrb.mxu3 %v446_v31 }
 0x227   :  { %476 = vmatpush.msrb.mxu0 %v429_v34  ;;  %505 = vmatpush.msrb.mxu1 %v445_v35  ;;  %v556_v26 = vmul.f32 %v1658_v22, %v1658_v22 }
 0x228   :  { %477 = vmatmul.f32.vlgmr.msrb.gmra.mxu0 %v421_v36  ;;  %506 = vmatmul.f32.vlgmr.msrb.gmra.mxu1 %v422_v37 }
 0x229   :  { %680 = vmatpush.msrb.mxu2 %v429_v34  ;;  %709 = vmatpush.msrb.mxu3 %v445_v35  ;;  %v557_v27 = vsel %vm158_vm3, %v556_v26, 0.0 }
 0x22a   :  { %558 = vadd.xlane.f32.xlu0 %v557_v27 }
 0x230   :  { %480 = vmatmul.f32.gmra.mxu0 %v423_v44  ;;  %509 = vmatmul.f32.gmra.mxu1 %v424_v45 }
 0x239   :  { %v367_v29 = vpop.xlane.xlu2 %366 }
 0x23a   :  { %v368_v33 = vrot.slane %v367_v29, 4 }
 0x23c   :  { %v369_v38 = vadd.f32 %v368_v33, %v367_v29 }
 0x23e   :  { %v370_v42 = vrot.slane %v369_v38, 2 }
 0x240   :  { %v371_v8 = vadd.f32 %v370_v42, %v369_v38 }
 0x28c   :  { %v246_v48 = vpop.xlane.xlu1 %245 }
 0x28d   :  { %v247_v49 = vrot.slane %v246_v48, 4 }
 0x28f   :  { %v248_v50 = vadd.f32 %v247_v49, %v246_v48  ;;  %v372_v49 = vrot.slane %v371_v8, 1 }
 0x291   :  { %v249_v51 = vrot.slane %v248_v50, 2 }
 0x293   :  { %v250_v52 = vadd.f32 %v249_v51, %v248_v50  ;;  %v425_v51 = vld [vmem:[%s1836_s5 + $0x20] sm:$0xff] }
 0x294   :  { %v325_v53 = vpop.xlane.xlu1 %324  ;;  %483 = vmatmul.f32.gmra.mxu0 %v425_v51 }
 0x295   :  { %v326_v54 = vrot.slane %v325_v53, 4  ;;  %v251_v55 = vrot.slane %v250_v52, 1 }
 0x297   :  { %v327_v56 = vadd.f32 %v326_v54, %v325_v53  ;;  %v252_v57 = vadd.f32 %v251_v55, %v250_v52  ;;  %v426_v52 = vld [vmem:[%s1836_s5 + $0x28] sm:$0xff] }
 0x298   :  { %512 = vmatmul.f32.gmra.mxu1 %v426_v52 }
 0x299   :  { %v328_v4 = vrot.slane %v327_v56, 2  ;;  %1058 = vpush %v252_v57  ;;  %v427_v57 = vld [vmem:[%s1836_s5 + $0x30] sm:$0xff] }
 0x29b   :  { %v329_v58 = vadd.f32 %v328_v4, %v327_v56  ;;  %v373_v56 = vadd.f32 %v372_v49, %v371_v8  ;;  %v428_v4 = vld [vmem:[%s1836_s5 + $0x38] sm:$0xff] }
 0x29c   :  { %486 = vmatmul.f32.gmra.mxu0 %v427_v57 }
 0x29d   :  { %v330_v59 = vrot.slane %v329_v58, 1 }
 0x29f   :  { %v331_v60 = vadd.f32 %v330_v59, %v329_v58 }
 0x2a0   :  { %515 = vmatmul.f32.gmra.mxu1 %v428_v4 }
 0x2a1   :  { %1060 = vpush %v331_v60 }
 0x2a5   :  { %v478_v24 = vpop.f32.mrf.mxu0  ;;  %v507_v25 = vpop.f32.mrf.mxu1 }
 0x2a6   :  { %v508_v31 = vadd.f32 %v507_v25, %v478_v24 }
 0x2a8   :  { %v531_v34 = vmul.f32 %v508_v31, %v508_v31  ;;  %v1040_v31 = vld [vmem:[%s1836_s5 + $0x48] sm:$0xff] }
 0x2a9   :  { %710 = vmatmul.f32.vlgmr.msrb.gmra.mxu3 %v1040_v31 }
 0x2ad   :  { %v481_v28 = vpop.f32.mrf.mxu0  ;;  %v510_v29 = vpop.f32.mrf.mxu1 }
 0x2ca   :  { %s1607_s27 = spop %1058 }
 0x2d2   :  { %s1061_s28 = spop %1060 }
 0x2d3   :  { %v333_v32 = vstv %s1061_s28  ;;  %s999_s28 = sshll.u32 %s1842_s11, 4  ;;  %s1289_s11 = smov [#allocation9]   ;;  %s1000_s28 = int_to_ptr.hbm [resolvable:$true] %s999_s28 }
 0x2d4   :  { %1118 = vrsqrt.f32 %v333_v32  ;;  %vm341_vm1 = vcmp.eq.f32.partialorder %v333_v32, inf  ;;  %v344_v53 = vand.u32 2147483648, %v333_v32  ;;  %vm343_vm2 = vcmp.eq.f32.partialorder %v333_v32, 0.0 }
 0x2da   :  { %v1119_v39 = vpop.eup %1118 }
 0x2db   :  { %v335_v41 = vmul.f32 %v1119_v39, %v333_v32 }
 0x2dd   :  { %v336_v43 = vmul.f32 %v1119_v39, %v335_v41 }
 0x2df   :  { %v337_v46 = vmul.f32 0.5, %v336_v43  ;;  %v535_v43 = vsel %vm122_vm0, %v531_v34, 0.0  ;;  %v1043_v34 = vld [vmem:[%s1836_s5 + $0x60] sm:$0xff] }
 0x2e1   :  { %v338_v10 = vsub.f32 1.5, %v337_v46 }
 0x2e3   :  { %v339_v48 = vmul.f32 %v1119_v39, %v338_v10  ;;  %v1284_v39 = vmov 32.0  }
 0x2e5   :  { %v340_v50 = vmul.f32 %v339_v48, %v333_v32 }
 0x2e7   :  { %v342_v54 = vsel %vm341_vm1, %v333_v32, %v340_v50  ;;  %v511_v32 = vadd.f32 %v510_v29, %v481_v28 }
 0x2e8   :  { %v345_v55 = vsel %vm343_vm2, %v344_v53, %v342_v54 }
 0x2e9   :  { %1062 = vpush %v345_v55  ;;  %v532_v35 = vmul.f32 %v511_v32, %v511_v32  ;;  %v1041_v32 = vld [vmem:[%s1836_s5 + $0x50] sm:$0xff] }
 0x2ea   :  { %1064 = vpush %v373_v56 }
 0x2eb   :  { %v536_v44 = vsel %vm122_vm0, %v532_v35, 0.0  ;;  %v1044_v35 = vld [vmem:[%s1836_s5 + $0x68] sm:$0xff] }
 0x2ec   :  { %v537_v10 = vadd.f32 %v536_v44, %v535_v43 }
 0x311   :  { %v484_v37 = vpop.f32.mrf.mxu0 }
 0x315   :  { %v513_v38 = vpop.f32.mrf.mxu1 }
 0x316   :  { %v514_v42 = vadd.f32 %v513_v38, %v484_v37  ;;  %v1046_v37 = vld [vmem:[%s1836_s5 + $0x78] sm:$0xff]  ;;  %v559_v38 = vpop.xlane.xlu0 %558 }
 0x318   :  { %v533_v45 = vmul.f32 %v514_v42, %v514_v42 }
 0x319   :  { %v487_v51 = vpop.f32.mrf.mxu0 }
 0x31a   :  { %s1645_s13 = spop %1062  ;;  %v538_v48 = vsel %vm122_vm0, %v533_v45, 0.0 }
 0x31b   :  { %s1065_s14 = spop %1064  ;;  %s347_s17 = smax.f32 %s1283_s26, %s1645_s13  ;;  %v539_v57 = vadd.f32 %v538_v48, %v537_v10 }
 0x31c   :  { %v375_v58 = vstv %s1065_s14  ;;  %v348_v23 = vstv %s347_s17  ;;  %s977_s17 = sshll.u32 %s1840_s9, 4  ;;  %s1287_s9 = smov [#allocation6]   ;;  %s978_s17 = int_to_ptr.hbm [resolvable:$true] %s977_s17 }
 0x31d   :  { %1120 = vrsqrt.f32 %v375_v58  ;;  %vm383_vm4 = vcmp.eq.f32.partialorder %v375_v58, inf  ;;  %v386_v2 = vand.u32 2147483648, %v375_v58  ;;  %vm385_vm5 = vcmp.eq.f32.partialorder %v375_v58, 0.0  ;;  %v516_v52 = vpop.f32.mrf.mxu1 }
 0x31e   :  { %1122 = vrcp.f32 %v348_v23  ;;  %v517_v54 = vadd.f32 %v516_v52, %v487_v51  ;;  %vm354_vm7 = vweird.f32 %v348_v23  ;;  %v360_v56 = vand.u32 2147483648, %v348_v23 }
 0x31f   :  { %1124 = vrcp.f32 %v1284_v39  ;;  %v560_v39 = vrot.slane %v559_v38, 4 }
 0x323   :  { %v1121_v59 = vpop.eup %1120 }
 0x324   :  { %v377_v60 = vmul.f32 %v1121_v59, %v375_v58  ;;  %v1123_v30 = vpop.eup %1122 }
 0x325   :  { %v350_v33 = vmul.f32 %v1123_v30, %v348_v23  ;;  %v1125_v8 = vpop.eup %1124  ;;  %vm355_vm6 = vweird.f32 %v1123_v30 }
 0x326   :  { %v378_v61 = vmul.f32 %v1121_v59, %v377_v60  ;;  %v549_v55 = vmul.f32 32.0, %v1125_v8  ;;  %vm1667_vm8 = vmor %vm354_vm7, %vm355_vm6  ;;  %v534_v60 = vmul.f32 %v517_v54, %v517_v54  ;;  %vm553_vm14 = vweird.f32 %v1125_v8 }
 0x327   :  { %v351_v36 = vsub.f32 1.0, %v350_v33  ;;  %v1042_v33 = vld [vmem:[%s1836_s5 + $0x58] sm:$0xff] }
 0x328   :  { %v379_v62 = vmul.f32 0.5, %v378_v61  ;;  %713 = vmatmul.f32.gmra.mxu3 %v1042_v33 }
 0x329   :  { %v352_v46 = vmul.f32 %v1123_v30, %v351_v36  ;;  %v1045_v36 = vld [vmem:[%s1836_s5 + $0x70] sm:$0xff] }
 0x32a   :  { %v380_v63 = vsub.f32 1.5, %v379_v62 }
 0x32b   :  { %v353_v50 = vadd.f32 %v1123_v30, %v352_v46 }
 0x32c   :  { %v381_v0 = vmul.f32 %v1121_v59, %v380_v63 }
 0x32d   :  { %v357_v63 = vsel %vm1667_vm8, %v1123_v30, %v353_v50  ;;  %v1039_v30 = vld [vmem:[%s1836_s5 + $0x40] sm:$0xff] }
 0x32e   :  { %v382_v1 = vmul.f32 %v381_v0, %v375_v58  ;;  %681 = vmatmul.f32.vlgmr.msrb.gmra.mxu2 %v1039_v30  ;;  %v1038_v30 = vld [vmem:[%s1835_s4 + $0x18] sm:$0xff] }
 0x32f   :  { %v724_v33 = vmul.f32 %v1038_v30, %v1038_v30 }
 0x330   :  { %v384_v3 = vsel %vm383_vm4, %v375_v58, %v382_v1  ;;  %v358_v58 = vand.u32 2147483647, %v348_v23  ;;  %v540_v1 = vsel %vm122_vm0, %v534_v60, 0.0  ;;  %716 = vmatmul.f32.gmra.mxu3 %v1044_v35 }
 0x331   :  { %v387_v5 = vsel %vm385_vm5, %v386_v2, %v384_v3  ;;  %v550_v2 = vsub.f32 1.0, %v549_v55  ;;  %v361_v3 = vor.u32 1.1754944e-38, %v360_v56 }
 0x332   :  { %1066 = vpush %v387_v5  ;;  %v541_v5 = vadd.f32 %v540_v1, %v539_v57  ;;  %vm359_vm10 = vcmp.eq.f32.partialorder %v358_v58, 8.507059e+37 }
 0x333   :  { %v362_v11 = vsel %vm359_vm10, %v361_v3, %v357_v63  ;;  %v551_v14 = vmul.f32 %v1125_v8, %v550_v2 }
 0x334   :  { %v542_v12 = vrot.slane %v541_v5, 4  ;;  %v363_v17 = vmul.f32 %v362_v11, %v1518_v47  ;;  %v711_v11 = vpop.f32.mrf.mxu3 }
 0x335   :  { %v552_v21 = vadd.f32 %v1125_v8, %v551_v14 }
 0x336   :  { %v543_v16 = vadd.f32 %v542_v12, %v541_v5  ;;  %684 = vmatmul.f32.gmra.mxu2 %v1041_v32 }
 0x337   :  { %v1677_v27 = vsel %vm553_vm14, %v1125_v8, %v552_v21 }
 0x338   :  { %v544_v19 = vrot.slane %v543_v16, 2  ;;  %719 = vmatmul.f32.gmra.mxu3 %v1046_v37  ;;  %v726_v37 = vsel %vm122_vm0, %v724_v33, 0.0 }
 0x33a   :  { %v545_v23 = vadd.f32 %v544_v19, %v543_v16 }
 0x33c   :  { %v546_v25 = vrot.slane %v545_v23, 1 }
 0x33e   :  { %v547_v28 = vadd.f32 %v546_v25, %v545_v23  ;;  %687 = vmatmul.f32.gmra.mxu2 %v1043_v34 }
 0x340   :  { %v1680_v29 = vmul.f32 %v1677_v27, %v547_v28 }
 0x342   :  { %v598_v47 = vmul.f32 %v1680_v29, %v1680_v29 }
 0x346   :  { %690 = vmatmul.f32.gmra.mxu2 %v1045_v36 }
 0x363   :  { %s1067_s18 = spop %1066 }
 0x364   :  { %s389_s19 = smax.f32 %s1283_s26, %s1067_s18  ;;  %s1286_s18 = smov [#allocation4]  }
 0x365   :  { %v390_v41 = vstv %s389_s19  ;;  %s975_s19 = sshll.u32 %s1286_s18, 4  ;;  %s976_s19 = int_to_ptr.vmem [resolvable:$true] %s975_s19 }
 0x366   :  { %1126 = vrcp.f32 %v390_v41  ;;  %v400_v61 = vand.u32 2147483647, %v390_v41  ;;  %v402_v62 = vand.u32 2147483648, %v390_v41  ;;  %vm396_vm11 = vweird.f32 %v390_v41 }
 0x368   :  { %v403_v9 = vor.u32 1.1754944e-38, %v402_v62  ;;  %vm401_vm13 = vcmp.eq.f32.partialorder %v400_v61, 8.507059e+37 }
 0x36c   :  { %v1127_v49 = vpop.eup %1126 }
 0x36d   :  { %v392_v53 = vmul.f32 %v1127_v49, %v390_v41  ;;  %vm397_vm9 = vweird.f32 %v1127_v49  ;;  %v561_v41 = vadd.f32 %v560_v39, %v559_v38 }
 0x36e   :  { %vm398_vm12 = vmor %vm396_vm11, %vm397_vm9 }
 0x36f   :  { %v393_v59 = vsub.f32 1.0, %v392_v53  ;;  %v562_v42 = vrot.slane %v561_v41, 2 }
 0x371   :  { %v394_v0 = vmul.f32 %v1127_v49, %v393_v59  ;;  %v563_v46 = vadd.f32 %v562_v42, %v561_v41 }
 0x373   :  { %v395_v6 = vadd.f32 %v1127_v49, %v394_v0  ;;  %v564_v48 = vrot.slane %v563_v46, 1 }
 0x375   :  { %v399_v13 = vsel %vm398_vm12, %v1127_v49, %v395_v6  ;;  %v565_v51 = vadd.f32 %v564_v48, %v563_v46 }
 0x376   :  { %v404_v15 = vsel %vm401_vm13, %v403_v9, %v399_v13 }
 0x377   :  { %v405_v18 = vmul.f32 %v404_v15, %v1511_v40  ;;  %v599_v40 = vsel %vm158_vm3, %v598_v47, 0.0 }
 0x378   :  { %600 = vadd.xlane.f32.xlu1 %v599_v40  ;;  %v1037_v40 = vld [vmem:[%s1835_s4 + $0x10] sm:$0xff] }
 0x379   :  { %v406_v20 = vsub.f32 %v363_v17, %v405_v18  ;;  %v723_v32 = vmul.f32 %v1037_v40, %v1037_v40 }
 0x37b   :  { %v407_v24 = vmul.f32 %v406_v20, %v406_v20  ;;  %v725_v36 = vsel %vm122_vm0, %v723_v32, 0.0 }
 0x37c   :  { %v727_v39 = vadd.f32 %v726_v37, %v725_v36 }
 0x37d   :  { %v408_v26 = vsel %vm158_vm3, %v407_v24, 0.0 }
 0x37e   :  { %409 = vadd.xlane.f32.xlu2 %v408_v26  ;;  %v728_v42 = vrot.slane %v727_v39, 4 }
 0x3ab   :  { %v714_v13 = vpop.f32.mrf.mxu3 }
 0x3b1   :  { %v682_v9 = vpop.f32.mrf.mxu2 }
 0x3b2   :  { %v712_v14 = vadd.f32 %v711_v11, %v682_v9 }
 0x3b3   :  { %v717_v16 = vpop.f32.mrf.mxu3 }
 0x3b4   :  { %v735_v17 = vmul.f32 %v712_v14, %v712_v14 }
 0x3b6   :  { %v739_v20 = vsel %vm122_vm0, %v735_v17, 0.0 }
 0x3b9   :  { %v685_v12 = vpop.f32.mrf.mxu2 }
 0x3ba   :  { %v715_v18 = vadd.f32 %v714_v13, %v685_v12 }
 0x3bb   :  { %v720_v25 = vpop.f32.mrf.mxu3 }
 0x3bc   :  { %v736_v21 = vmul.f32 %v715_v18, %v715_v18 }
 0x3be   :  { %v740_v26 = vsel %vm122_vm0, %v736_v21, 0.0 }
 0x3bf   :  { %v741_v31 = vadd.f32 %v740_v26, %v739_v20 }
 0x3c1   :  { %v688_v15 = vpop.f32.mrf.mxu2 }
 0x3c2   :  { %v718_v19 = vadd.f32 %v717_v16, %v688_v15 }
 0x3c4   :  { %v737_v23 = vmul.f32 %v718_v19, %v718_v19 }
 0x3c6   :  { %v742_v28 = vsel %vm122_vm0, %v737_v23, 0.0 }
 0x3c7   :  { %v743_v35 = vadd.f32 %v742_v28, %v741_v31 }
 0x3c9   :  { %v691_v24 = vpop.f32.mrf.mxu2 }
 0x3ca   :  { %v721_v47 = vadd.f32 %v720_v25, %v691_v24 }
 0x3cc   :  { %v738_v34 = vmul.f32 %v721_v47, %v721_v47 }
 0x3ce   :  { %v744_v38 = vsel %vm122_vm0, %v738_v34, 0.0  ;;  %vm854_vm0 = vcmask 73728  }
 0x3cf   :  { %v745_v41 = vadd.f32 %v744_v38, %v743_v35 }
 0x3eb   :  { %v601_v52 = vpop.xlane.xlu1 %600 }
 0x3ec   :  { %v602_v54 = vrot.slane %v601_v52, 4 }
 0x3ee   :  { %v603_v56 = vadd.f32 %v602_v54, %v601_v52 }
 0x3f0   :  { %v604_v58 = vrot.slane %v603_v56, 2 }
 0x3f1   :  { %v410_v43 = vpop.xlane.xlu2 %409 }
 0x3f2   :  { %v411_v44 = vrot.slane %v410_v43, 4  ;;  %v605_v61 = vadd.f32 %v604_v58, %v603_v56 }
 0x3f4   :  { %v412_v45 = vadd.f32 %v411_v44, %v410_v43  ;;  %v606_v0 = vrot.slane %v605_v61, 1  ;;  %v746_v43 = vrot.slane %v745_v41, 4  ;;  %v729_v44 = vadd.f32 %v728_v42, %v727_v39  ;;  %v852_v39 = vld [vmem:[%s1839_s8] sm:$0x1]  ;;  %v851_v42 = vld [vmem:[%s1838_s7 + $0x1] sm:$0x1] }
 0x3f6   :  { %v413_v8 = vrot.slane %v412_v45, 2  ;;  %v607_v6 = vadd.f32 %v606_v0, %v605_v61  ;;  %v730_v46 = vrot.slane %v729_v44, 2 }
 0x3f8   :  { %v414_v10 = vadd.f32 %v413_v8, %v412_v45  ;;  %v747_v45 = vadd.f32 %v746_v43, %v745_v41  ;;  %v879_v41 = vsel %vm854_vm0, %v852_v39, -inf }
 0x3fa   :  { %v415_v49 = vrot.slane %v414_v10, 1  ;;  %v748_v8 = vrot.slane %v747_v45, 2 }
 0x3fc   :  { %v416_v50 = vadd.f32 %v415_v49, %v414_v10  ;;  %v731_v10 = vadd.f32 %v730_v46, %v729_v44  ;;  %v749_v48 = vadd.f32 %v748_v8, %v747_v45 }
 0x3fe   :  { %1068 = vpush %v416_v50  ;;  %v732_v50 = vrot.slane %v731_v10, 1  ;;  %v750_v52 = vrot.slane %v749_v48, 1 }
 0x3ff   :  { %1070 = vpush %v565_v51 }
 0x400   :  { %v733_v51 = vadd.f32 %v732_v50, %v731_v10  ;;  %v751_v54 = vadd.f32 %v750_v52, %v749_v48 }
 0x402   :  { %v1731_v56 = vmul.f32 %v751_v54, %v1677_v27 }
 0x42f   :  { %s1069_s5 = spop %1068 }
 0x430   :  { %s418_s16 = sadd.f32 %s1069_s5, %s1607_s27  ;;  %s1071_s3 = spop %1070 }
 0x431   :  { %v567_v53 = vstv %s1071_s3  ;;  %s1048_s3 = sld [smem:[#allocation3 + $0x1]] }
 0x432   :  { %v961_v55 = vstv %s418_s16  ;;  %1128 = vrsqrt.f32 %v567_v53  ;;  %vm575_vm1 = vcmp.eq.f32.partialorder %v567_v53, inf  ;;  %v578_v2 = vand.u32 2147483648, %v567_v53 }
 0x433   :  { %963 = vst.msk [vmem:[#allocation4] sm:$0x1] %vm962_vm15, %v961_v55  ;;  %vm577_vm2 = vcmp.eq.f32.partialorder %v567_v53, 0.0 }
 0x434   :  { %980 = dma.vmem_to_hbm [thread:$0]  %s976_s19, 16, %s978_s17, [#allocation5]  }
 0x438   :  { %v1129_v57 = vpop.eup %1128 }
 0x439   :  { %v569_v4 = vmul.f32 %v1129_v57, %v567_v53 }
 0x43b   :  { %v570_v59 = vmul.f32 %v1129_v57, %v569_v4 }
 0x43d   :  { %v571_v60 = vmul.f32 0.5, %v570_v59  ;;  %v795_v59 = vmul.f32 %v1731_v56, %v1731_v56 }
 0x43f   :  { %v572_v62 = vsub.f32 1.5, %v571_v60  ;;  %v796_v61 = vsel %vm158_vm3, %v795_v59, 0.0 }
 0x440   :  { %797 = vadd.xlane.f32.xlu1 %v796_v61 }
 0x441   :  { %v573_v63 = vmul.f32 %v1129_v57, %v572_v62  ;;  %v1745_v62 = vld [vmem:[%s1838_s7] sm:$0x1]  ;;  %s926_s7 = sld [smem:[#allocation3]] }
 0x443   :  { %v574_v1 = vmul.f32 %v573_v63, %v567_v53 }
 0x445   :  { %v576_v3 = vsel %vm575_vm1, %v567_v53, %v574_v1  ;;  %v1726_v53 = vmul.f32 %v733_v51, %v1471_v7  ;;  %v1740_v7 = vld [vmem:[%s1839_s8 + $0x1] sm:$0x1] }
 0x446   :  { %v579_v5 = vsel %vm577_vm2, %v578_v2, %v576_v3  ;;  %v882_v0 = vsel %vm854_vm0, %v1740_v7, -inf  ;;  %v855_v2 = vsel %vm854_vm0, %v1745_v62, -inf }
 0x447   :  { %1072 = vpush %v579_v5  ;;  %v753_v55 = vmul.f32 %v1726_v53, %v1726_v53 }
 0x448   :  { %1074 = vpush %v607_v6  ;;  %856 = vmax.xlane.f32.xlu1 %v855_v2 }
 0x449   :  { %v754_v58 = vsel %vm158_vm3, %v753_v55, 0.0 }
 0x44a   :  { %755 = vadd.xlane.f32.xlu0 %v754_v58 }
 0x452   :  { %883 = vmax.xlane.f32.xlu0 %v882_v0 }
 0x478   :  { %s1723_s4 = spop %1072 }
 0x479   :  { %s1075_s6 = spop %1074  ;;  %s581_s24 = smax.f32 %s1283_s26, %s1723_s4 }
 0x47a   :  { %v609_v49 = vstv %s1075_s6  ;;  %v582_v11 = vstv %s581_s24  ;;  %s986_s4 = sshll.u32 %s1287_s9, 4  ;;  %s987_s4 = int_to_ptr.vmem [resolvable:$true] %s986_s4 }
 0x47b   :  { %1130 = vrsqrt.f32 %v609_v49  ;;  %vm617_vm4 = vcmp.eq.f32.partialorder %v609_v49, inf  ;;  %v620_v5 = vand.u32 2147483648, %v609_v49  ;;  %vm619_vm5 = vcmp.eq.f32.partialorder %v609_v49, 0.0 }
 0x47c   :  { %1132 = vrcp.f32 %v582_v11  ;;  %v594_v20 = vand.u32 2147483648, %v582_v11  ;;  %vm588_vm7 = vweird.f32 %v582_v11  ;;  %v592_v21 = vand.u32 2147483647, %v582_v11 }
 0x47e   :  { %v595_v47 = vor.u32 1.1754944e-38, %v594_v20  ;;  %vm593_vm10 = vcmp.eq.f32.partialorder %v592_v21, 8.507059e+37 }
 0x481   :  { %v1131_v57 = vpop.eup %1130 }
 0x482   :  { %v611_v4 = vmul.f32 %v1131_v57, %v609_v49  ;;  %v1133_v12 = vpop.eup %1132 }
 0x483   :  { %v584_v13 = vmul.f32 %v1133_v12, %v582_v11  ;;  %vm589_vm6 = vweird.f32 %v1133_v12 }
 0x484   :  { %v612_v60 = vmul.f32 %v1131_v57, %v611_v4  ;;  %vm590_vm8 = vmor %vm588_vm7, %vm589_vm6 }
 0x485   :  { %v585_v14 = vsub.f32 1.0, %v584_v13 }
 0x486   :  { %v613_v27 = vmul.f32 0.5, %v612_v60 }
 0x487   :  { %v586_v16 = vmul.f32 %v1133_v12, %v585_v14 }
 0x488   :  { %v614_v63 = vsub.f32 1.5, %v613_v27 }
 0x489   :  { %v587_v18 = vadd.f32 %v1133_v12, %v586_v16  ;;  %v924_v16 = vlaneseq }
 0x48a   :  { %v615_v1 = vmul.f32 %v1131_v57, %v614_v63 }
 0x48b   :  { %v591_v28 = vsel %vm590_vm8, %v1133_v12, %v587_v18  ;;  %v927_v18 = vstv %s926_s7  ;;  %v1782_v20 = vand.u32 127, %v924_v16 }
 0x48c   :  { %v616_v3 = vmul.f32 %v615_v1, %v609_v49  ;;  %v596_v31 = vsel %vm593_vm10, %v595_v47, %v591_v28 }
 0x48d   :  { %v597_v34 = vmul.f32 %v596_v31, %v1658_v22  ;;  %v858_v22 = vsel %vm854_vm0, %v851_v42, -inf  ;;  %vm928_vm14 = vcmp.eq.s32.totalorder %v1782_v20, %v927_v18 }
 0x48e   :  { %v618_v6 = vsel %vm617_vm4, %v609_v49, %v616_v3 }
 0x48f   :  { %v621_v9 = vsel %vm619_vm5, %v620_v5, %v618_v6 }
 0x490   :  { %1076 = vpush %v621_v9 }
 0x4b3   :  { %v1765_v43 = vpop.xlane.xlu1 %797 }
 0x4b4   :  { %v799_v47 = vrot.slane %v1765_v43, 4 }
 0x4bb   :  { %v857_v46 = vpop.xlane.xlu1 %856 }
 0x4bc   :  { %v861_v10 = vsub.f32 %v1745_v62, %v857_v46 }
 0x4be   :  { %v863_v48 = vmul.f32 1.442695, %v861_v10 }
 0x4c1   :  { %s1077_s1 = spop %1076 }
 0x4c2   :  { %s623_s25 = smax.f32 %s1283_s26, %s1077_s1 }
 0x4c3   :  { %v624_v15 = vstv %s623_s25 }
 0x4c4   :  { %1134 = vrcp.f32 %v624_v15  ;;  %v636_v24 = vand.u32 2147483648, %v624_v15  ;;  %v634_v26 = vand.u32 2147483647, %v624_v15  ;;  %vm630_vm11 = vweird.f32 %v624_v15 }
 0x4c6   :  { %v637_v30 = vor.u32 1.1754944e-38, %v636_v24  ;;  %vm635_vm13 = vcmp.eq.f32.partialorder %v634_v26, 8.507059e+37 }
 0x4ca   :  { %v1135_v17 = vpop.eup %1134 }
 0x4cb   :  { %v626_v19 = vmul.f32 %v1135_v17, %v624_v15  ;;  %vm631_vm9 = vweird.f32 %v1135_v17 }
 0x4cc   :  { %vm632_vm12 = vmor %vm630_vm11, %vm631_vm9 }
 0x4cd   :  { %v627_v23 = vsub.f32 1.0, %v626_v19 }
 0x4cf   :  { %v628_v25 = vmul.f32 %v1135_v17, %v627_v23  ;;  %v1285_v23 = vmov 0.0  }
 0x4d0   :  { %v1047_v24 = vsel %vm928_vm14, 1.0, %v1285_v23 }
 0x4d1   :  { %v629_v40 = vadd.f32 %v1135_v17, %v628_v25 }
 0x4d3   :  { %v633_v32 = vsel %vm632_vm12, %v1135_v17, %v629_v40  ;;  %v800_v40 = vadd.f32 %v799_v47, %v1765_v43 }
 0x4d4   :  { %v638_v33 = vsel %vm635_vm13, %v637_v30, %v633_v32 }
 0x4d5   :  { %v639_v35 = vmul.f32 %v638_v33, %v1680_v29  ;;  %v756_v29 = vpop.xlane.xlu0 %755  ;;  %v801_v32 = vrot.slane %v800_v40, 2 }
 0x4d6   :  { %v757_v54 = vrot.slane %v756_v29, 4 }
 0x4d7   :  { %v640_v36 = vsub.f32 %v597_v34, %v639_v35  ;;  %v802_v35 = vadd.f32 %v801_v32, %v800_v40 }
 0x4d8   :  { %v758_v55 = vadd.f32 %v757_v54, %v756_v29 }
 0x4d9   :  { %v641_v37 = vmul.f32 %v640_v36, %v640_v36 }
 0x4da   :  { %v759_v57 = vrot.slane %v758_v55, 2 }
 0x4db   :  { %v642_v38 = vsel %vm158_vm3, %v641_v37, 0.0 }
 0x4dc   :  { %643 = vadd.xlane.f32.xlu2 %v642_v38  ;;  %v760_v60 = vadd.f32 %v759_v57, %v758_v55  ;;  %v803_v38 = vrot.slane %v802_v35, 1 }
 0x4dd   :  { %v884_v44 = vpop.xlane.xlu0 %883 }
 0x4de   :  { %v1768_v45 = vsub.f32 %v1740_v7, %v884_v44  ;;  %v761_v62 = vrot.slane %v760_v60, 1  ;;  %v804_v29 = vadd.f32 %v803_v38, %v802_v35 }
 0x4e0   :  { %v889_v8 = vmul.f32 1.442695, %v1768_v45  ;;  %v762_v3 = vadd.f32 %v761_v62, %v760_v60 }
 0x4e2   :  { %1136 = vpow2.f32 %v889_v8 }
 0x4e3   :  { %1138 = vpow2.f32 %v863_v48 }
 0x4e4   :  { %880 = vmax.xlane.f32.xlu2 %v879_v41 }
 0x4e8   :  { %v1137_v49 = vpop.eup %1136 }
 0x4e9   :  { %v894_v50 = vsel %vm854_vm0, %v1137_v49, 0.0  ;;  %v1139_v51 = vpop.eup %1138 }
 0x4ea   :  { %895 = vadd.xlane.f32.xlu1 %v894_v50  ;;  %v867_v52 = vsel %vm854_vm0, %v1139_v51, 0.0 }
 0x4ec   :  { %859 = vmax.xlane.f32.xlu2 %v858_v22 }
 0x4f4   :  { %868 = vadd.xlane.f32.xlu2 %v867_v52 }
 0x54f   :  { %v644_v4 = vpop.xlane.xlu2 %643 }
 0x550   :  { %v645_v58 = vrot.slane %v644_v4, 4 }
 0x552   :  { %v646_v59 = vadd.f32 %v645_v58, %v644_v4 }
 0x554   :  { %v647_v61 = vrot.slane %v646_v59, 2 }
 0x556   :  { %v648_v7 = vadd.f32 %v647_v61, %v646_v59 }
 0x557   :  { %v881_v27 = vpop.xlane.xlu2 %880 }
 0x558   :  { %v1774_v63 = vsub.f32 %v852_v39, %v881_v27  ;;  %v649_v0 = vrot.slane %v648_v7, 1 }
 0x55a   :  { %v887_v1 = vmul.f32 1.442695, %v1774_v63  ;;  %v650_v2 = vadd.f32 %v649_v0, %v648_v7 }
 0x55c   :  { %1140 = vpow2.f32 %v887_v1  ;;  %1078 = vpush %v650_v2 }
 0x55d   :  { %1080 = vpush %v762_v3  ;;  %v896_v44 = vpop.xlane.xlu1 %895 }
 0x55f   :  { %v860_v5 = vpop.xlane.xlu2 %859 }
 0x560   :  { %v1777_v6 = vsub.f32 %v851_v42, %v860_v5 }
 0x562   :  { %v1141_v9 = vpop.eup %1140  ;;  %v865_v11 = vmul.f32 1.442695, %v1777_v6 }
 0x563   :  { %v891_v12 = vsel %vm854_vm0, %v1141_v9, 0.0 }
 0x564   :  { %1142 = vpow2.f32 %v865_v11  ;;  %892 = vadd.xlane.f32.xlu0 %v891_v12 }
 0x567   :  { %v869_v15 = vpop.xlane.xlu2 %868 }
 0x568   :  { %1144 = vlog2.f32 %v869_v15 }
 0x56a   :  { %v1143_v13 = vpop.eup %1142 }
 0x56b   :  { %v870_v14 = vsel %vm854_vm0, %v1143_v13, 0.0 }
 0x56c   :  { %871 = vadd.xlane.f32.xlu0 %v870_v14 }
 0x56e   :  { %v1145_v17 = vpop.eup %1144 }
 0x56f   :  { %v874_v19 = vmul.f32 0.6931472, %v1145_v17 }
 0x571   :  { %v1784_v21 = vsub.f32 %v861_v10, %v874_v19 }
 0x573   :  { %v931_v25 = vmul.f32 %v1047_v24, %v1784_v21 }
 0x575   :  { %v932_v26 = vsel %vm854_vm0, %v931_v25, 0.0 }
 0x576   :  { %933 = vadd.xlane.f32.xlu0 %v932_v26 }
 0x58d   :  { %s1789_s8 = spop %1078 }
 0x58e   :  { %s1081_s13 = spop %1080 }
 0x58f   :  { %v764_v28 = vstv %s1081_s13  ;;  %s1010_s13 = sshll.u32 %s1843_s12, 4  ;;  %s1011_s13 = int_to_ptr.hbm [resolvable:$true] %s1010_s13 }
 0x590   :  { %1146 = vrsqrt.f32 %v764_v28  ;;  %vm772_vm1 = vcmp.eq.f32.partialorder %v764_v28, inf  ;;  %v775_v41 = vand.u32 2147483648, %v764_v28  ;;  %vm774_vm2 = vcmp.eq.f32.partialorder %v764_v28, 0.0 }
 0x591   :  { %1148 = vlog2.f32 %v896_v44 }
 0x596   :  { %v1147_v30 = vpop.eup %1146 }
 0x597   :  { %v766_v31 = vmul.f32 %v1147_v30, %v764_v28  ;;  %v1149_v43 = vpop.eup %1148 }
 0x598   :  { %v900_v10 = vmul.f32 0.6931472, %v1149_v43 }
 0x599   :  { %v767_v33 = vmul.f32 %v1147_v30, %v766_v31 }
 0x59a   :  { %v902_v49 = vsub.f32 %v1768_v45, %v900_v10 }
 0x59b   :  { %v768_v34 = vmul.f32 0.5, %v767_v33 }
 0x59c   :  { %v905_v57 = vmul.f32 1.442695, %v902_v49 }
 0x59d   :  { %v769_v36 = vsub.f32 1.5, %v768_v34 }
 0x59f   :  { %v770_v37 = vmul.f32 %v1147_v30, %v769_v36 }
 0x5a1   :  { %v771_v39 = vmul.f32 %v770_v37, %v764_v28 }
 0x5a3   :  { %v773_v42 = vsel %vm772_vm1, %v764_v28, %v771_v39 }
 0x5a4   :  { %v776_v22 = vsel %vm774_vm2, %v775_v41, %v773_v42 }
 0x5a5   :  { %1082 = vpush %v776_v22  ;;  %v945_v22 = vstv %s1048_s3 }
 0x5a6   :  { %1084 = vpush %v804_v29  ;;  %vm946_vm14 = vcmp.eq.s32.totalorder %v1782_v20, %v945_v22 }
 0x5d6   :  { %s1794_s14 = spop %1082 }
 0x5d7   :  { %s1085_s2 = spop %1084  ;;  %v893_v46 = vpop.xlane.xlu0 %892  ;;  %s778_s15 = smax.f32 %s1283_s26, %s1794_s14 }
 0x5d8   :  { %v806_v8 = vstv %s1085_s2  ;;  %1150 = vlog2.f32 %v893_v46  ;;  %v779_v15 = vstv %s778_s15  ;;  %v1049_v46 = vsel %vm946_vm14, 1.0, %v1285_v23 }
 0x5d9   :  { %1152 = vrsqrt.f32 %v806_v8  ;;  %vm814_vm4 = vcmp.eq.f32.partialorder %v806_v8, inf  ;;  %v817_v3 = vand.u32 2147483648, %v806_v8  ;;  %vm816_vm5 = vcmp.eq.f32.partialorder %v806_v8, 0.0 }
 0x5da   :  { %v791_v28 = vand.u32 2147483648, %v779_v15  ;;  %vm785_vm7 = vweird.f32 %v779_v15  ;;  %v789_v47 = vand.u32 2147483647, %v779_v15 }
 0x5dc   :  { %v792_v34 = vor.u32 1.1754944e-38, %v791_v28  ;;  %vm790_vm10 = vcmp.eq.f32.partialorder %v789_v47, 8.507059e+37 }
 0x5de   :  { %v1151_v48 = vpop.eup %1150 }
 0x5df   :  { %v898_v50 = vmul.f32 0.6931472, %v1151_v48  ;;  %v872_v51 = vpop.xlane.xlu0 %871  ;;  %v1153_v52 = vpop.eup %1152 }
 0x5e0   :  { %1154 = vlog2.f32 %v872_v51  ;;  %v808_v54 = vmul.f32 %v1153_v52, %v806_v8 }
 0x5e1   :  { %v901_v55 = vsub.f32 %v1774_v63, %v898_v50 }
 0x5e2   :  { %v809_v58 = vmul.f32 %v1153_v52, %v808_v54 }
 0x5e3   :  { %v903_v4 = vmul.f32 1.442695, %v901_v55  ;;  %v907_v62 = vsub.f32 %v901_v55, %v1784_v21 }
 0x5e4   :  { %v810_v59 = vmul.f32 0.5, %v809_v58 }
 0x5e5   :  { %1156 = vpow2.f32 %v903_v4 }
 0x5e6   :  { %v1155_v60 = vpop.eup %1154  ;;  %1158 = vpow2.f32 %v905_v57  ;;  %v811_v7 = vsub.f32 1.5, %v810_v59 }
 0x5e7   :  { %v876_v61 = vmul.f32 0.6931472, %v1155_v60  ;;  %1160 = vrcp.f32 %v779_v15 }
 0x5e8   :  { %v812_v45 = vmul.f32 %v1153_v52, %v811_v7 }
 0x5e9   :  { %v1799_v27 = vsub.f32 %v1777_v6, %v876_v61 }
 0x5ea   :  { %v813_v63 = vmul.f32 %v812_v45, %v806_v8 }
 0x5eb   :  { %v1157_v0 = vpop.eup %1156  ;;  %v908_v1 = vsub.f32 %v902_v49, %v1799_v27 }
 0x5ec   :  { %v1159_v2 = vpop.eup %1158  ;;  %v909_v5 = vmul.f32 %v1157_v0, %v907_v62  ;;  %v815_v9 = vsel %vm814_vm4, %v806_v8, %v813_v63  ;;  %v949_v8 = vmul.f32 %v1049_v46, %v1799_v27 }
 0x5ed   :  { %v910_v11 = vmul.f32 %v1159_v2, %v908_v1  ;;  %v818_v12 = vsel %vm816_vm5, %v817_v3, %v815_v9  ;;  %v1161_v16 = vpop.eup %1160 }
 0x5ee   :  { %v911_v13 = vsel %vm854_vm0, %v909_v5, 0.0  ;;  %1086 = vpush %v818_v12  ;;  %v781_v17 = vmul.f32 %v1161_v16, %v779_v15  ;;  %vm786_vm6 = vweird.f32 %v1161_v16  ;;  %v950_v10 = vsel %vm854_vm0, %v949_v8, 0.0 }
 0x5ef   :  { %v912_v6 = vsel %vm854_vm0, %v910_v11, 0.0  ;;  %vm787_vm8 = vmor %vm785_vm7, %vm786_vm6 }
 0x5f0   :  { %v913_v14 = vadd.f32 %v912_v6, %v911_v13  ;;  %v782_v18 = vsub.f32 1.0, %v781_v17 }
 0x5f2   :  { %914 = vadd.xlane.f32.xlu2 %v913_v14  ;;  %v783_v21 = vmul.f32 %v1161_v16, %v782_v18 }
 0x5f4   :  { %v784_v25 = vadd.f32 %v1161_v16, %v783_v21 }
 0x5f6   :  { %v788_v33 = vsel %vm787_vm8, %v1161_v16, %v784_v25 }
 0x5f7   :  { %v793_v37 = vsel %vm790_vm10, %v792_v34, %v788_v33 }
 0x5f8   :  { %v794_v41 = vmul.f32 %v793_v37, %v1726_v53 }
 0x61f   :  { %s1087_s5 = spop %1086 }
 0x620   :  { %s820_s16 = smax.f32 %s1283_s26, %s1087_s5 }
 0x621   :  { %v821_v19 = vstv %s820_s16 }
 0x622   :  { %1162 = vrcp.f32 %v821_v19  ;;  %v833_v30 = vand.u32 2147483648, %v821_v19  ;;  %v831_v32 = vand.u32 2147483647, %v821_v19  ;;  %vm827_vm11 = vweird.f32 %v821_v19 }
 0x624   :  { %v834_v36 = vor.u32 1.1754944e-38, %v833_v30  ;;  %vm832_vm13 = vcmp.eq.f32.partialorder %v831_v32, 8.507059e+37 }
 0x628   :  { %v1163_v24 = vpop.eup %1162 }
 0x629   :  { %v823_v26 = vmul.f32 %v1163_v24, %v821_v19  ;;  %vm828_vm9 = vweird.f32 %v1163_v24 }
 0x62a   :  { %vm829_vm12 = vmor %vm827_vm11, %vm828_vm9 }
 0x62b   :  { %v824_v40 = vsub.f32 1.0, %v823_v26 }
 0x62d   :  { %v825_v31 = vmul.f32 %v1163_v24, %v824_v40 }
 0x62f   :  { %v826_v35 = vadd.f32 %v1163_v24, %v825_v31 }
 0x631   :  { %v830_v38 = vsel %vm829_vm12, %v1163_v24, %v826_v35 }
 0x632   :  { %v835_v39 = vsel %vm832_vm13, %v834_v36, %v830_v38 }
 0x633   :  { %v836_v42 = vmul.f32 %v835_v39, %v1731_v56  ;;  %v934_v56 = vpop.xlane.xlu0 %933 }
 0x634   :  { %v935_v48 = vrot.slane %v934_v56, 4 }
 0x635   :  { %v837_v29 = vsub.f32 %v794_v41, %v836_v42 }
 0x636   :  { %v936_v23 = vadd.f32 %v935_v48, %v934_v56 }
 0x637   :  { %v838_v44 = vmul.f32 %v837_v29, %v837_v29 }
 0x638   :  { %v937_v52 = vrot.slane %v936_v23, 2 }
 0x639   :  { %v839_v43 = vsel %vm158_vm3, %v838_v44, 0.0 }
 0x63a   :  { %840 = vadd.xlane.f32.xlu1 %v839_v43  ;;  %v938_v4 = vadd.f32 %v937_v52, %v936_v23 }
 0x63c   :  { %v939_v45 = vrot.slane %v938_v4, 1 }
 0x63e   :  { %v940_v2 = vadd.f32 %v939_v45, %v938_v4 }
 0x642   :  { %951 = vadd.xlane.f32.xlu1 %v950_v10 }
 0x665   :  { %v915_v53 = vpop.xlane.xlu2 %914 }
 0x666   :  { %v916_v20 = vrot.slane %v915_v53, 4 }
 0x668   :  { %v917_v49 = vadd.f32 %v916_v20, %v915_v53 }
 0x66a   :  { %v918_v50 = vrot.slane %v917_v49, 2 }
 0x66c   :  { %v919_v57 = vadd.f32 %v918_v50, %v917_v49 }
 0x66e   :  { %v920_v61 = vrot.slane %v919_v57, 1 }
 0x670   :  { %v921_v1 = vadd.f32 %v920_v61, %v919_v57 }
 0x6ad   :  { %v841_v51 = vpop.xlane.xlu1 %840 }
 0x6ae   :  { %v842_v54 = vrot.slane %v841_v51, 4 }
 0x6b0   :  { %v843_v55 = vadd.f32 %v842_v54, %v841_v51 }
 0x6b2   :  { %v844_v58 = vrot.slane %v843_v55, 2 }
 0x6b4   :  { %v845_v59 = vadd.f32 %v844_v58, %v843_v55 }
 0x6b5   :  { %v952_v60 = vpop.xlane.xlu1 %951 }
 0x6b6   :  { %v953_v7 = vrot.slane %v952_v60, 4  ;;  %v846_v27 = vrot.slane %v845_v59, 1 }
 0x6b8   :  { %v954_v62 = vadd.f32 %v953_v7, %v952_v60  ;;  %v847_v0 = vadd.f32 %v846_v27, %v845_v59 }
 0x6ba   :  { %v955_v63 = vrot.slane %v954_v62, 2  ;;  %1088 = vpush %v847_v0 }
 0x6bb   :  { %1090 = vpush %v921_v1 }
 0x6bc   :  { %v956_v3 = vadd.f32 %v955_v63, %v954_v62  ;;  %1092 = vpush %v940_v2 }
 0x6be   :  { %v957_v5 = vrot.slane %v956_v3, 1 }
 0x6c0   :  { %v958_v9 = vadd.f32 %v957_v5, %v956_v3 }
 0x6c2   :  { %1094 = vpush %v958_v9 }
 0x6eb   :  { %s1089_s24 = spop %1088 }
 0x6ec   :  { %s849_s29 = sadd.f32 %s1089_s24, %s1789_s8  ;;  %s1091_s30 = spop %1090 }
 0x6ed   :  { %v966_v11 = vstv %s1091_s30  ;;  %s1093_s10 = spop %1092  ;;  %s1008_s8 = sshll.u32 %s1289_s11, 4  ;;  %s1009_s8 = int_to_ptr.vmem [resolvable:$true] %s1008_s8 }
 0x6ee   :  { %v964_v12 = vstv %s849_s29  ;;  %967 = vst.msk [vmem:[#allocation8] sm:$0x1] %vm962_vm15, %v966_v11  ;;  %s942_s14 = ssub.f32 0.0, %s1093_s10 }
 0x6ef   :  { %965 = vst.msk [vmem:[#allocation6] sm:$0x1] %vm962_vm15, %v964_v12 }
 0x6f0   :  { %991 = dma.vmem_to_hbm [thread:$0]  %s987_s4, 16, %s989_s21, [#allocation7]  }
 0x6f1   :  { %1002 = dma.vmem_to_hbm [thread:$0]  %s998_s23, 16, %s1000_s28, [#allocation7]  }
 0x6f3   :  { %s1095_s2 = spop %1094 }
 0x6f4   :  { %s960_s15 = ssub.f32 %s942_s14, %s1095_s2 }
 0x6f6   :  { %v968_v13 = vstv %s960_s15 }
 0x6f7   :  { %969 = vst.msk [vmem:[#allocation9] sm:$0x1] %vm962_vm15, %v968_v13 }
 0x6f8   :  { %1013 = dma.vmem_to_hbm [thread:$0]  %s1009_s8, 16, %s1011_s13, [#allocation10]  }
 0x6f9   :  { %1274 = dma.done.wait [#allocation5], 16  }
 0x6fa   :  { %1275 = vsyncadd [#allocation5], 4294967280 }
 0x6fb   :  { %1276 = dma.done.wait [#allocation7], 32  }
 0x6fc   :  { %1277 = vsyncadd [#allocation7], 4294967264 }
 0x6fd   :  { %1278 = dma.done.wait [#allocation10], 16  }
 0x6fe   :  { %1279 = vsyncadd [#allocation10], 4294967280 }
 0x6ff   :  { %1030 = vsyncpa [#allocation5], 1 }
 0x700   :  { %1031 = vsyncpa [#allocation7], 1 }
 0x701   :  { %1032 = vsyncpa [#allocation10], 1 }

</bundles_post_ra>
